<compile_context>
chip_gen: v7x
topology: tpu7x:2x2x1
jax: 0.10.0
libtpu: 0.0.40
codegen_flags: <defaults>
</compile_context>

<pallas_src>
from functools import partial

import jax
import jax.numpy as jnp
import numpy as np
from jax.experimental import pallas as pl
from jax.experimental.pallas import tpu as pltpu


def _mlp_col_chunks(hidden, target=1024):
    """Static (offset, size) chunks of the MLP hidden dim (bounds f32 intermediates)."""
    if hidden <= target:
        return ((0, hidden),)
    for c in range(target, 127, -1):
        if hidden % c == 0:
            return tuple((o, c) for o in range(0, hidden, c))
    return ((0, hidden),)


def _block_kernel(x_ref, pol_ref,
                  n1w_ref, n1b_ref,
                  qkvw_ref, projw_ref, projb_ref,
                  n2w_ref, n2b_ref,
                  fc1w_ref, fc1b_ref, fc2w_ref, fc2b_ref,
                  out_ref, attn_ref,
                  *, num_heads, eps, ln_eps):
    block_b, N, C = x_ref.shape
    H = num_heads
    hd = C // H
    G = block_b * H
    R = block_b * N
    scale = hd ** -0.5

    # NOTE: the (block_b, N, C) <-> (R, C) fold is a free view only when N % 8 == 0
    # (true here).  TODO(synk): for DeiT N=197, pad N to a multiple of 8 in the wrapper.
    x = x_ref[...].reshape(R, C)                               # (R, C) f32, all tile rows

    def layernorm(v, w_ref, b_ref):
        # one-pass LN: mean and mean-of-squares in a single traversal
        mu = jnp.mean(v, axis=-1, keepdims=True)
        ms = jnp.mean(v * v, axis=-1, keepdims=True)
        var = ms - mu * mu
        return (v - mu) * jax.lax.rsqrt(var + ln_eps) * w_ref[...] + b_ref[...]

    # ---------------------------- attention branch ----------------------------
    n1 = layernorm(x, n1w_ref, n1b_ref)
    qkv = jnp.dot(n1.astype(jnp.bfloat16), qkvw_ref[...],
                  preferred_element_type=jnp.float32)          # (R, 3C) f32, one MXU matmul
    q_all = qkv[:, 0:C] * scale                                # fold 1/sqrt(hd) into q
    k_all = qkv[:, C:2 * C]
    v_all = qkv[:, 2 * C:3 * C]

    def to_heads(t):
        # (R, C) heads-along-lanes -> (G, N, hd) with (batch, head) leading.
        # One lane slice per head per tensor (3*H total per tile), stacked once.
        parts = [t[:, h * hd:(h + 1) * hd].reshape(block_b, N, hd) for h in range(H)]
        return jnp.stack(parts, axis=1).reshape(G, N, hd).astype(jnp.bfloat16)

    qg, kg, vg = to_heads(q_all), to_heads(k_all), to_heads(v_all)

    # one batched contraction for every (batch, head) pair in the tile
    s = jnp.einsum("gqd,gkd->gqk", qg, kg,
                   preferred_element_type=jnp.float32)         # (G, N, N) f32
    s4 = s.reshape(block_b, H, N, N)

    # policy-softmax diagonal via iota compare (no materialized eye)
    ri = jax.lax.broadcasted_iota(jnp.int32, (N, N), 0)
    ci = jax.lax.broadcasted_iota(jnp.int32, (N, N), 1)
    pol4 = pol_ref[...].reshape(block_b, 1, 1, N)
    attn_policy = jnp.where(ri == ci, 1.0, pol4)               # (block_b, 1, N, N)

    m = jnp.max(s4, axis=-1, keepdims=True)                    # max over raw scores (as ref)
    e = jnp.exp(s4 - m) * attn_policy
    denom = jnp.sum(e, axis=-1, keepdims=True) + eps
    inv = pl.reciprocal(denom, approx=True)                    # EUP slot
    inv = inv * (2.0 - denom * inv)                            # one Newton step -> ~f32 accuracy
    a4 = (e + eps / N) * inv                                   # (block_b, H, N, N)

    attn_ref[...] = a4.astype(attn_ref.dtype)                  # single lane-dense store

    y = jnp.einsum("gqk,gkd->gqd", a4.reshape(G, N, N).astype(jnp.bfloat16), vg,
                   preferred_element_type=jnp.float32)         # (G, N, hd) f32
    y4 = y.reshape(block_b, H, N, hd)

    # fold the head concat into the projection: attn_out = sum_h y_h @ proj_w[h]
    # (no scratch buffer, no hd-wide masked scatter stores)
    attn_out = None
    for h in range(H):
        yh = y4[:, h].reshape(R, hd).astype(jnp.bfloat16)
        part = jnp.dot(yh, projw_ref[h], preferred_element_type=jnp.float32)
        attn_out = part if attn_out is None else attn_out + part
    attn_out = attn_out + projb_ref[...]

    x1 = x + attn_out                                          # residual 1 (f32)

    # ------------------------------ MLP branch ------------------------------
    n2 = layernorm(x1, n2w_ref, n2b_ref).astype(jnp.bfloat16)
    Ch = fc1w_ref.shape[1]
    h2 = None
    for c0, cs in _mlp_col_chunks(Ch):
        h1 = jnp.dot(n2, fc1w_ref[:, c0:c0 + cs],
                     preferred_element_type=jnp.float32) + fc1b_ref[:, c0:c0 + cs]
        # TODO(synk): torch nn.GELU default is exact erf GELU; using the tanh
        # approximation in-kernel (guaranteed Mosaic lowering), |diff| < ~1e-3.
        g = jax.nn.gelu(h1, approximate=True).astype(jnp.bfloat16)
        part = jnp.dot(g, fc2w_ref[c0:c0 + cs, :], preferred_element_type=jnp.float32)
        h2 = part if h2 is None else h2 + part
    h2 = h2 + fc2b_ref[...]

    out = x1 + h2                                              # residual 2
    out_ref[...] = out.reshape(block_b, N, C).astype(out_ref.dtype)


def _vmem_limit_bytes():
    """Generation-aware VMEM budget (v7x: 64 MiB physical -> ~48 MiB; v5e/v6e -> 96 MiB)."""
    try:
        cap = pltpu.get_tpu_info().vmem_capacity_bytes
    except Exception:
        cap = 128 * 1024 * 1024
    return int(min(cap * 3 // 4, 96 * 1024 * 1024))


def _pick_block_b(batch, seq, C, Ch, num_heads, budget_bytes):
    """Largest divisor of `batch` whose per-step working set fits the budget.
    Prefer >=2 grid steps (both v7x TCs under ('parallel',)) only when the tile
    still keeps >=256 rows for the MXU; otherwise one big step (1-TC v5e/v6e)."""
    mlp_chunk = min(Ch, 1024)

    def footprint(bb):
        rows = bb * seq
        attn_bytes = bb * num_heads * seq * seq * 4
        return (4 * attn_bytes               # scores / exp / attn f32 temps + attn out buffers
                + 8 * rows * C * 4           # x, x1, LN, qkv, proj acc, out
                + 2 * rows * mlp_chunk * 4)  # chunked MLP intermediates

    divs = [d for d in range(1, batch + 1) if batch % d == 0]
    fitting = [d for d in divs if footprint(d) <= budget_bytes] or [1]
    best = max(fitting)
    multi = [d for d in fitting if batch // d >= 2]
    if multi and max(multi) * seq >= 256:
        return max(multi)
    return best


def block_forward(x, policy, params, *, num_heads, block_b=None, attn_dtype=jnp.float32):
    """x: (B, N, C) f32, policy: (B, N, 1) f32. Returns (out (B,N,C), attn (B,H,N,N)).
    attn_dtype=jnp.bfloat16 halves the dominant HBM write on v5e/v6e if acceptable."""
    B, N, C = x.shape
    Ch = params["fc1_w"].shape[1]
    hd = C // num_heads

    vmem_limit = _vmem_limit_bytes()

    bf16 = lambda w: w.astype(jnp.bfloat16)                  # MXU operands in bf16
    row = lambda v: v.reshape(1, -1).astype(jnp.float32)     # biases / norm params stay f32

    weights = (
        row(params["norm1_w"]), row(params["norm1_b"]),
        bf16(params["qkv_w"]),
        bf16(params["proj_w"]).reshape(num_heads, hd, C),    # heads leading: in-kernel head fold
        row(params["proj_b"]),
        row(params["norm2_w"]), row(params["norm2_b"]),
        bf16(params["fc1_w"]), row(params["fc1_b"]),
        bf16(params["fc2_w"]), row(params["fc2_b"]),
    )
    weight_bytes = sum(int(w.size) * w.dtype.itemsize for w in weights)

    if block_b is None:
        budget = max(vmem_limit - weight_bytes - (4 << 20), 2 << 20)
        block_b = _pick_block_b(B, N, C, Ch, num_heads, budget)
    assert B % block_b == 0
    grid = (B // block_b,)

    pol_t = jnp.transpose(policy, (0, 2, 1))                 # (B, 1, N): key axis lane-dense

    # Grid-invariant weights: whole-array, single-buffered VMEM residents (no
    # per-step double-buffered copies).
    # TODO(synk): on v7x, VMEM_SHARED placement would avoid each TC holding a copy.
    wspec = pl.BlockSpec(memory_space=pltpu.MemorySpace.VMEM)

    grid_spec = pltpu.PrefetchScalarGridSpec(
        num_scalar_prefetch=0,
        grid=grid,
        in_specs=[
            pl.BlockSpec((block_b, N, C), lambda i: (i, 0, 0)),      # x
            pl.BlockSpec((block_b, 1, N), lambda i: (i, 0, 0)),      # policy (transposed)
        ] + [wspec] * len(weights),
        out_specs=[
            pl.BlockSpec((block_b, N, C), lambda i: (i, 0, 0)),
            pl.BlockSpec((block_b, num_heads, N, N), lambda i: (i, 0, 0, 0)),
        ],
    )

    kernel = partial(_block_kernel, num_heads=num_heads, eps=1e-6, ln_eps=1e-5)

    out, attn = pl.pallas_call(
        kernel,
        out_shape=(
            jax.ShapeDtypeStruct((B, N, C), jnp.float32),
            jax.ShapeDtypeStruct((B, num_heads, N, N), attn_dtype),
        ),
        grid_spec=grid_spec,
        compiler_params=pltpu.CompilerParams(
            dimension_semantics=("parallel",),
            vmem_limit_bytes=vmem_limit,
        ),
    )(x, pol_t, *weights)
    return out, attn


def _reference_block(x, policy, p, num_heads):
    """Pure-JAX f32 reference mirroring the PyTorch Block forward."""
    B, N, C = x.shape
    hd = C // num_heads
    scale = hd ** -0.5

    def ln(v, w, b):
        mu = v.mean(-1, keepdims=True)
        var = ((v - mu) ** 2).mean(-1, keepdims=True)
        return (v - mu) * jax.lax.rsqrt(var + 1e-5) * w + b

    xn = ln(x, p["norm1_w"], p["norm1_b"])
    qkv = (xn @ p["qkv_w"]).reshape(B, N, 3, num_heads, hd).transpose(2, 0, 3, 1, 4)
    q, k, v = qkv[0], qkv[1], qkv[2]                                    # (B, H, N, hd)
    attn = jnp.einsum("bhqd,bhkd->bhqk", q, k) * scale
    attn_policy = policy.reshape(B, 1, 1, N)
    eye = jnp.eye(N, dtype=attn_policy.dtype).reshape(1, 1, N, N)
    attn_policy = attn_policy + (1.0 - attn_policy) * eye
    m = jnp.max(attn, axis=-1, keepdims=True)
    e = jnp.exp(attn - m) * attn_policy
    attn = (e + 1e-6 / N) / (jnp.sum(e, axis=-1, keepdims=True) + 1e-6)
    y = jnp.einsum("bhqk,bhkd->bhqd", attn, v).transpose(0, 2, 1, 3).reshape(B, N, C)
    y = y @ p["proj_w"] + p["proj_b"]
    x1 = x + y
    h = ln(x1, p["norm2_w"], p["norm2_b"]) @ p["fc1_w"] + p["fc1_b"]
    h = jax.nn.gelu(h, approximate=False)          # exact erf GELU (torch nn.GELU default)
    h = h @ p["fc2_w"] + p["fc2_b"]
    return x1 + h, attn


def _init_params(key, C, Ch):
    ks = jax.random.split(key, 11)
    return {
        "norm1_w": 1.0 + 0.1 * jax.random.normal(ks[0], (C,), jnp.float32),
        "norm1_b": 0.05 * jax.random.normal(ks[1], (C,), jnp.float32),
        "qkv_w": 0.02 * jax.random.normal(ks[2], (C, 3 * C), jnp.float32),
        "proj_w": 0.02 * jax.random.normal(ks[3], (C, C), jnp.float32),
        "proj_b": 0.01 * jax.random.normal(ks[4], (C,), jnp.float32),
        "norm2_w": 1.0 + 0.1 * jax.random.normal(ks[5], (C,), jnp.float32),
        "norm2_b": 0.05 * jax.random.normal(ks[6], (C,), jnp.float32),
        "fc1_w": 0.02 * jax.random.normal(ks[7], (C, Ch), jnp.float32),
        "fc1_b": 0.01 * jax.random.normal(ks[8], (Ch,), jnp.float32),
        "fc2_w": 0.02 * jax.random.normal(ks[9], (Ch, C), jnp.float32),
        "fc2_b": 0.01 * jax.random.normal(ks[10], (C,), jnp.float32),
    }


if __name__ == "__main__":
    # Small shapes consistent with the module: B=2, N=8 tokens, C=32, 4 heads, mlp_ratio=4.
    B, N, C, H = 2, 8, 32, 4
    Ch = 4 * C

    key = jax.random.PRNGKey(0)
    kx, kp, kparam = jax.random.split(key, 3)

    x = jax.random.normal(kx, (B, N, C), dtype=jnp.float32)
    policy = (jax.random.uniform(kp, (B, N, 1)) > 0.3).astype(jnp.float32)  # token keep-mask

    params = _init_params(kparam, C, Ch)

    out, attn = block_forward(x, policy, params, num_heads=H)
    jax.block_until_ready((out, attn))

    ref_out, ref_attn = _reference_block(x, policy, params, H)
    np.testing.assert_allclose(np.asarray(out), np.asarray(ref_out), rtol=2e-2, atol=2e-3)
    np.testing.assert_allclose(np.asarray(attn), np.asarray(ref_attn), rtol=2e-2, atol=2e-3)

    print("KERNEL_OK")
</pallas_src>

<mosaic_0001>
module attributes {stable_mosaic.version = 11 : i64} {
  func.func @_block_kernel(%arg0: i32, %arg1: memref<2x8x32xf32, #tpu.memory_space<vmem>>, %arg2: memref<2x1x8xf32, #tpu.memory_space<vmem>>, %arg3: memref<1x32xf32, #tpu.memory_space<vmem>>, %arg4: memref<1x32xf32, #tpu.memory_space<vmem>>, %arg5: memref<32x96xbf16, #tpu.memory_space<vmem>>, %arg6: memref<4x8x32xbf16, #tpu.memory_space<vmem>>, %arg7: memref<1x32xf32, #tpu.memory_space<vmem>>, %arg8: memref<1x32xf32, #tpu.memory_space<vmem>>, %arg9: memref<1x32xf32, #tpu.memory_space<vmem>>, %arg10: memref<32x128xbf16, #tpu.memory_space<vmem>>, %arg11: memref<1x128xf32, #tpu.memory_space<vmem>>, %arg12: memref<128x32xbf16, #tpu.memory_space<vmem>>, %arg13: memref<1x32xf32, #tpu.memory_space<vmem>>, %arg14: memref<2x8x32xf32, #tpu.memory_space<vmem>>, %arg15: memref<2x4x8x8xf32, #tpu.memory_space<vmem>>) attributes {dimension_semantics = [#tpu.dimension_semantics<parallel>], iteration_bounds = array<i64: 1>, scalar_prefetch = 0 : i64, scratch_operands = 0 : i64, tpu.core_type = #tpu.core_type<tc>, window_params = [{transform_indices = @transform_0, window_bounds = array<i64: 2, 8, 32>}, {transform_indices = @transform_1, window_bounds = array<i64: 2, 1, 8>}, {pipeline_mode = #tpu.pipeline_mode<synchronous>, transform_indices = @transform_2, window_bounds = array<i64: 1, 32>}, {pipeline_mode = #tpu.pipeline_mode<synchronous>, transform_indices = @transform_3, window_bounds = array<i64: 1, 32>}, {pipeline_mode = #tpu.pipeline_mode<synchronous>, transform_indices = @transform_4, window_bounds = array<i64: 32, 96>}, {pipeline_mode = #tpu.pipeline_mode<synchronous>, transform_indices = @transform_5, window_bounds = array<i64: 4, 8, 32>}, {pipeline_mode = #tpu.pipeline_mode<synchronous>, transform_indices = @transform_6, window_bounds = array<i64: 1, 32>}, {pipeline_mode = #tpu.pipeline_mode<synchronous>, transform_indices = @transform_7, window_bounds = array<i64: 1, 32>}, {pipeline_mode = #tpu.pipeline_mode<synchronous>, transform_indices = @transform_8, window_bounds = array<i64: 1, 32>}, {pipeline_mode = #tpu.pipeline_mode<synchronous>, transform_indices = @transform_9, window_bounds = array<i64: 32, 128>}, {pipeline_mode = #tpu.pipeline_mode<synchronous>, transform_indices = @transform_10, window_bounds = array<i64: 1, 128>}, {pipeline_mode = #tpu.pipeline_mode<synchronous>, transform_indices = @transform_11, window_bounds = array<i64: 128, 32>}, {pipeline_mode = #tpu.pipeline_mode<synchronous>, transform_indices = @transform_12, window_bounds = array<i64: 1, 32>}, {transform_indices = @transform_13, window_bounds = array<i64: 2, 8, 32>}, {transform_indices = @transform_14, window_bounds = array<i64: 2, 4, 8, 8>}]} {
    %c0 = arith.constant 0 : index
    %c0_0 = arith.constant 0 : index
    %c0_1 = arith.constant 0 : index
    %0 = vector.load %arg1[%c0, %c0_0, %c0_1] : memref<2x8x32xf32, #tpu.memory_space<vmem>>, vector<2x8x32xf32>
    %1 = vector.shape_cast %0 : vector<2x8x32xf32> to vector<16x32xf32>
    %cst = arith.constant dense<0.000000e+00> : vector<16xf32>
    %2 = vector.multi_reduction <add>, %1, %cst [1] : vector<16x32xf32> to vector<16xf32>
    %3 = vector.shape_cast %2 : vector<16xf32> to vector<16x1xf32>
    %cst_2 = arith.constant 3.200000e+01 : f32
    %4 = vector.broadcast %cst_2 : f32 to vector<16x1xf32>
    %5 = arith.divf %3, %4 : vector<16x1xf32>
    %6 = arith.mulf %1, %1 : vector<16x32xf32>
    %cst_3 = arith.constant dense<0.000000e+00> : vector<16xf32>
    %7 = vector.multi_reduction <add>, %6, %cst_3 [1] : vector<16x32xf32> to vector<16xf32>
    %8 = vector.shape_cast %7 : vector<16xf32> to vector<16x1xf32>
    %cst_4 = arith.constant 3.200000e+01 : f32
    %9 = vector.broadcast %cst_4 : f32 to vector<16x1xf32>
    %10 = arith.divf %8, %9 : vector<16x1xf32>
    %11 = arith.mulf %5, %5 : vector<16x1xf32>
    %12 = arith.subf %10, %11 : vector<16x1xf32>
    %13 = vector.broadcast %5 : vector<16x1xf32> to vector<16x32xf32>
    %14 = arith.subf %1, %13 : vector<16x32xf32>
    %cst_5 = arith.constant 9.99999974E-6 : f32
    %15 = vector.broadcast %cst_5 : f32 to vector<16x1xf32>
    %16 = arith.addf %12, %15 : vector<16x1xf32>
    %17 = math.rsqrt %16 : vector<16x1xf32>
    %18 = vector.broadcast %17 : vector<16x1xf32> to vector<16x32xf32>
    %19 = arith.mulf %14, %18 : vector<16x32xf32>
    %c0_6 = arith.constant 0 : index
    %c0_7 = arith.constant 0 : index
    %20 = vector.load %arg3[%c0_6, %c0_7] : memref<1x32xf32, #tpu.memory_space<vmem>>, vector<1x32xf32>
    %21 = vector.broadcast %20 : vector<1x32xf32> to vector<16x32xf32>
    %22 = arith.mulf %19, %21 : vector<16x32xf32>
    %c0_8 = arith.constant 0 : index
    %c0_9 = arith.constant 0 : index
    %23 = vector.load %arg4[%c0_8, %c0_9] : memref<1x32xf32, #tpu.memory_space<vmem>>, vector<1x32xf32>
    %24 = vector.broadcast %23 : vector<1x32xf32> to vector<16x32xf32>
    %25 = arith.addf %22, %24 : vector<16x32xf32>
    %26 = arith.truncf %25 : vector<16x32xf32> to vector<16x32xbf16>
    %c0_10 = arith.constant 0 : index
    %c0_11 = arith.constant 0 : index
    %27 = vector.load %arg5[%c0_10, %c0_11] : memref<32x96xbf16, #tpu.memory_space<vmem>>, vector<32x96xbf16>
    %cst_12 = arith.constant dense<0.000000e+00> : vector<16x96xf32>
    %28 = tpu.matmul %26, %27, %cst_12 {dimension_numbers = #tpu.dot_dimension_numbers<[1], [0], [0], [1], [0, 0, 1, 1], [], []>} : vector<16x32xbf16>, vector<32x96xbf16>, vector<16x96xf32> -> vector<16x96xf32>
    %29 = vector.extract_strided_slice %28 {offsets = [0, 0], sizes = [16, 32], strides = [1, 1]} : vector<16x96xf32> to vector<16x32xf32>
    %cst_13 = arith.constant 0.353553385 : f32
    %30 = vector.broadcast %cst_13 : f32 to vector<16x32xf32>
    %31 = arith.mulf %29, %30 : vector<16x32xf32>
    %32 = vector.extract_strided_slice %28 {offsets = [0, 32], sizes = [16, 32], strides = [1, 1]} : vector<16x96xf32> to vector<16x32xf32>
    %33 = vector.extract_strided_slice %28 {offsets = [0, 64], sizes = [16, 32], strides = [1, 1]} : vector<16x96xf32> to vector<16x32xf32>
    %34 = vector.extract_strided_slice %31 {offsets = [0, 0], sizes = [16, 8], strides = [1, 1]} : vector<16x32xf32> to vector<16x8xf32>
    %35 = vector.shape_cast %34 : vector<16x8xf32> to vector<2x8x8xf32>
    %36 = vector.extract_strided_slice %31 {offsets = [0, 8], sizes = [16, 8], strides = [1, 1]} : vector<16x32xf32> to vector<16x8xf32>
    %37 = vector.shape_cast %36 : vector<16x8xf32> to vector<2x8x8xf32>
    %38 = vector.extract_strided_slice %31 {offsets = [0, 16], sizes = [16, 8], strides = [1, 1]} : vector<16x32xf32> to vector<16x8xf32>
    %39 = vector.shape_cast %38 : vector<16x8xf32> to vector<2x8x8xf32>
    %40 = vector.extract_strided_slice %31 {offsets = [0, 24], sizes = [16, 8], strides = [1, 1]} : vector<16x32xf32> to vector<16x8xf32>
    %41 = vector.shape_cast %40 : vector<16x8xf32> to vector<2x8x8xf32>
    %42 = vector.shape_cast %35 : vector<2x8x8xf32> to vector<2x1x8x8xf32>
    %43 = vector.shape_cast %37 : vector<2x8x8xf32> to vector<2x1x8x8xf32>
    %44 = vector.shape_cast %39 : vector<2x8x8xf32> to vector<2x1x8x8xf32>
    %45 = vector.shape_cast %41 : vector<2x8x8xf32> to vector<2x1x8x8xf32>
    %46 = tpu.concatenate %42, %43, %44, %45 in 1 : vector<2x1x8x8xf32>, vector<2x1x8x8xf32>, vector<2x1x8x8xf32>, vector<2x1x8x8xf32> -> vector<2x4x8x8xf32>
    %47 = vector.shape_cast %46 : vector<2x4x8x8xf32> to vector<8x8x8xf32>
    %48 = arith.truncf %47 : vector<8x8x8xf32> to vector<8x8x8xbf16>
    %49 = vector.extract_strided_slice %32 {offsets = [0, 0], sizes = [16, 8], strides = [1, 1]} : vector<16x32xf32> to vector<16x8xf32>
    %50 = vector.shape_cast %49 : vector<16x8xf32> to vector<2x8x8xf32>
    %51 = vector.extract_strided_slice %32 {offsets = [0, 8], sizes = [16, 8], strides = [1, 1]} : vector<16x32xf32> to vector<16x8xf32>
    %52 = vector.shape_cast %51 : vector<16x8xf32> to vector<2x8x8xf32>
    %53 = vector.extract_strided_slice %32 {offsets = [0, 16], sizes = [16, 8], strides = [1, 1]} : vector<16x32xf32> to vector<16x8xf32>
    %54 = vector.shape_cast %53 : vector<16x8xf32> to vector<2x8x8xf32>
    %55 = vector.extract_strided_slice %32 {offsets = [0, 24], sizes = [16, 8], strides = [1, 1]} : vector<16x32xf32> to vector<16x8xf32>
    %56 = vector.shape_cast %55 : vector<16x8xf32> to vector<2x8x8xf32>
    %57 = vector.shape_cast %50 : vector<2x8x8xf32> to vector<2x1x8x8xf32>
    %58 = vector.shape_cast %52 : vector<2x8x8xf32> to vector<2x1x8x8xf32>
    %59 = vector.shape_cast %54 : vector<2x8x8xf32> to vector<2x1x8x8xf32>
    %60 = vector.shape_cast %56 : vector<2x8x8xf32> to vector<2x1x8x8xf32>
    %61 = tpu.concatenate %57, %58, %59, %60 in 1 : vector<2x1x8x8xf32>, vector<2x1x8x8xf32>, vector<2x1x8x8xf32>, vector<2x1x8x8xf32> -> vector<2x4x8x8xf32>
    %62 = vector.shape_cast %61 : vector<2x4x8x8xf32> to vector<8x8x8xf32>
    %63 = arith.truncf %62 : vector<8x8x8xf32> to vector<8x8x8xbf16>
    %64 = vector.extract_strided_slice %33 {offsets = [0, 0], sizes = [16, 8], strides = [1, 1]} : vector<16x32xf32> to vector<16x8xf32>
    %65 = vector.shape_cast %64 : vector<16x8xf32> to vector<2x8x8xf32>
    %66 = vector.extract_strided_slice %33 {offsets = [0, 8], sizes = [16, 8], strides = [1, 1]} : vector<16x32xf32> to vector<16x8xf32>
    %67 = vector.shape_cast %66 : vector<16x8xf32> to vector<2x8x8xf32>
    %68 = vector.extract_strided_slice %33 {offsets = [0, 16], sizes = [16, 8], strides = [1, 1]} : vector<16x32xf32> to vector<16x8xf32>
    %69 = vector.shape_cast %68 : vector<16x8xf32> to vector<2x8x8xf32>
    %70 = vector.extract_strided_slice %33 {offsets = [0, 24], sizes = [16, 8], strides = [1, 1]} : vector<16x32xf32> to vector<16x8xf32>
    %71 = vector.shape_cast %70 : vector<16x8xf32> to vector<2x8x8xf32>
    %72 = vector.shape_cast %65 : vector<2x8x8xf32> to vector<2x1x8x8xf32>
    %73 = vector.shape_cast %67 : vector<2x8x8xf32> to vector<2x1x8x8xf32>
    %74 = vector.shape_cast %69 : vector<2x8x8xf32> to vector<2x1x8x8xf32>
    %75 = vector.shape_cast %71 : vector<2x8x8xf32> to vector<2x1x8x8xf32>
    %76 = tpu.concatenate %72, %73, %74, %75 in 1 : vector<2x1x8x8xf32>, vector<2x1x8x8xf32>, vector<2x1x8x8xf32>, vector<2x1x8x8xf32> -> vector<2x4x8x8xf32>
    %77 = vector.shape_cast %76 : vector<2x4x8x8xf32> to vector<8x8x8xf32>
    %78 = arith.truncf %77 : vector<8x8x8xf32> to vector<8x8x8xbf16>
    "tpu.trace_start"() <{level = 10 : i32, message = "gqd,gkd->gqk"}> : () -> ()
    %cst_14 = arith.constant dense<0.000000e+00> : vector<8x8x8xf32>
    %79 = tpu.matmul %48, %63, %cst_14 {dimension_numbers = #tpu.dot_dimension_numbers<[2], [2], [1], [1], [0, 0, 0, 1, 1, 1], [0], [0]>} : vector<8x8x8xbf16>, vector<8x8x8xbf16>, vector<8x8x8xf32> -> vector<8x8x8xf32>
    "tpu.trace_stop"() : () -> ()
    %80 = vector.shape_cast %79 : vector<8x8x8xf32> to vector<2x4x8x8xf32>
    %81 = tpu.iota {dimensions = array<i32: 0>} : vector<8x8xi32>
    %82 = tpu.iota {dimensions = array<i32: 1>} : vector<8x8xi32>
    %c0_15 = arith.constant 0 : index
    %c0_16 = arith.constant 0 : index
    %c0_17 = arith.constant 0 : index
    %83 = vector.load %arg2[%c0_15, %c0_16, %c0_17] : memref<2x1x8xf32, #tpu.memory_space<vmem>>, vector<2x1x8xf32>
    %84 = vector.shape_cast %83 : vector<2x1x8xf32> to vector<2x1x1x8xf32>
    %85 = arith.cmpi eq, %81, %82 : vector<8x8xi32>
    %cst_18 = arith.constant 1.000000e+00 : f32
    %86 = vector.shape_cast %85 : vector<8x8xi1> to vector<1x1x8x8xi1>
    %87 = vector.broadcast %86 : vector<1x1x8x8xi1> to vector<2x1x8x8xi1>
    %88 = vector.broadcast %cst_18 : f32 to vector<2x1x8x8xf32>
    %89 = vector.shape_cast %84 : vector<2x1x1x8xf32> to vector<2x1x1x8xf32>
    %90 = vector.broadcast %89 : vector<2x1x1x8xf32> to vector<2x1x8x8xf32>
    %91 = arith.select %87, %88, %90 : vector<2x1x8x8xi1>, vector<2x1x8x8xf32>
    %cst_19 = arith.constant dense<0xFF800000> : vector<2x4x8xf32>
    %92 = vector.multi_reduction <maximumf>, %80, %cst_19 [3] : vector<2x4x8x8xf32> to vector<2x4x8xf32>
    %93 = vector.shape_cast %92 : vector<2x4x8xf32> to vector<2x4x8x1xf32>
    %94 = vector.broadcast %93 : vector<2x4x8x1xf32> to vector<2x4x8x8xf32>
    %95 = arith.subf %80, %94 : vector<2x4x8x8xf32>
    %96 = math.exp %95 : vector<2x4x8x8xf32>
    %97 = vector.broadcast %91 : vector<2x1x8x8xf32> to vector<2x4x8x8xf32>
    %98 = arith.mulf %96, %97 : vector<2x4x8x8xf32>
    %cst_20 = arith.constant dense<0.000000e+00> : vector<2x4x8xf32>
    %99 = vector.multi_reduction <add>, %98, %cst_20 [3] : vector<2x4x8x8xf32> to vector<2x4x8xf32>
    %100 = vector.shape_cast %99 : vector<2x4x8xf32> to vector<2x4x8x1xf32>
    %cst_21 = arith.constant 9.99999997E-7 : f32
    %101 = vector.broadcast %cst_21 : f32 to vector<2x4x8x1xf32>
    %102 = arith.addf %100, %101 : vector<2x4x8x1xf32>
    %103 = tpu.reciprocal %102 {approx = true} : vector<2x4x8x1xf32> -> vector<2x4x8x1xf32>
    %104 = arith.mulf %102, %103 : vector<2x4x8x1xf32>
    %cst_22 = arith.constant 2.000000e+00 : f32
    %105 = vector.broadcast %cst_22 : f32 to vector<2x4x8x1xf32>
    %106 = arith.subf %105, %104 : vector<2x4x8x1xf32>
    %107 = arith.mulf %103, %106 : vector<2x4x8x1xf32>
    %cst_23 = arith.constant 1.250000e-07 : f32
    %108 = vector.broadcast %cst_23 : f32 to vector<2x4x8x8xf32>
    %109 = arith.addf %98, %108 : vector<2x4x8x8xf32>
    %110 = vector.broadcast %107 : vector<2x4x8x1xf32> to vector<2x4x8x8xf32>
    %111 = arith.mulf %109, %110 : vector<2x4x8x8xf32>
    %c0_24 = arith.constant 0 : index
    %c0_25 = arith.constant 0 : index
    %c0_26 = arith.constant 0 : index
    %c0_27 = arith.constant 0 : index
    %112 = vector.load %arg15[%c0_24, %c0_25, %c0_26, %c0_27] : memref<2x4x8x8xf32, #tpu.memory_space<vmem>>, vector<2x4x8x8xf32>
    tpu.vector_store %arg15[%c0_24, %c0_25, %c0_26, %c0_27], %111 {strides = array<i32>} : memref<2x4x8x8xf32, #tpu.memory_space<vmem>>, vector<2x4x8x8xf32>,
    %113 = vector.shape_cast %111 : vector<2x4x8x8xf32> to vector<8x8x8xf32>
    %114 = arith.truncf %113 : vector<8x8x8xf32> to vector<8x8x8xbf16>
    "tpu.trace_start"() <{level = 10 : i32, message = "gqk,gkd->gqd"}> : () -> ()
    %cst_28 = arith.constant dense<0.000000e+00> : vector<8x8x8xf32>
    %115 = tpu.matmul %114, %78, %cst_28 {dimension_numbers = #tpu.dot_dimension_numbers<[2], [1], [1], [2], [0, 0, 0, 1, 1, 2], [0], [0]>} : vector<8x8x8xbf16>, vector<8x8x8xbf16>, vector<8x8x8xf32> -> vector<8x8x8xf32>
    "tpu.trace_stop"() : () -> ()
    %116 = vector.shape_cast %115 : vector<8x8x8xf32> to vector<2x4x8x8xf32>
    %117 = vector.extract_strided_slice %116 {offsets = [0, 0, 0, 0], sizes = [2, 1, 8, 8], strides = [1, 1, 1, 1]} : vector<2x4x8x8xf32> to vector<2x1x8x8xf32>
    %118 = vector.shape_cast %117 : vector<2x1x8x8xf32> to vector<2x8x8xf32>
    %119 = vector.shape_cast %118 : vector<2x8x8xf32> to vector<16x8xf32>
    %120 = arith.truncf %119 : vector<16x8xf32> to vector<16x8xbf16>
    %c0_29 = arith.constant 0 : index
    %c0_30 = arith.constant 0 : index
    %c0_31 = arith.constant 0 : index
    %121 = vector.load %arg6[%c0_29, %c0_30, %c0_31] : memref<4x8x32xbf16, #tpu.memory_space<vmem>>, vector<1x8x32xbf16>
    %122 = vector.shape_cast %121 : vector<1x8x32xbf16> to vector<8x32xbf16>
    %cst_32 = arith.constant dense<0.000000e+00> : vector<16x32xf32>
    %123 = tpu.matmul %120, %122, %cst_32 {dimension_numbers = #tpu.dot_dimension_numbers<[1], [0], [0], [1], [0, 0, 1, 1], [], []>} : vector<16x8xbf16>, vector<8x32xbf16>, vector<16x32xf32> -> vector<16x32xf32>
    %124 = vector.extract_strided_slice %116 {offsets = [0, 1, 0, 0], sizes = [2, 1, 8, 8], strides = [1, 1, 1, 1]} : vector<2x4x8x8xf32> to vector<2x1x8x8xf32>
    %125 = vector.shape_cast %124 : vector<2x1x8x8xf32> to vector<2x8x8xf32>
    %126 = vector.shape_cast %125 : vector<2x8x8xf32> to vector<16x8xf32>
    %127 = arith.truncf %126 : vector<16x8xf32> to vector<16x8xbf16>
    %c1 = arith.constant 1 : index
    %c0_33 = arith.constant 0 : index
    %c0_34 = arith.constant 0 : index
    %128 = vector.load %arg6[%c1, %c0_33, %c0_34] : memref<4x8x32xbf16, #tpu.memory_space<vmem>>, vector<1x8x32xbf16>
    %129 = vector.shape_cast %128 : vector<1x8x32xbf16> to vector<8x32xbf16>
    %cst_35 = arith.constant dense<0.000000e+00> : vector<16x32xf32>
    %130 = tpu.matmul %127, %129, %cst_35 {dimension_numbers = #tpu.dot_dimension_numbers<[1], [0], [0], [1], [0, 0, 1, 1], [], []>} : vector<16x8xbf16>, vector<8x32xbf16>, vector<16x32xf32> -> vector<16x32xf32>
    %131 = arith.addf %123, %130 : vector<16x32xf32>
    %132 = vector.extract_strided_slice %116 {offsets = [0, 2, 0, 0], sizes = [2, 1, 8, 8], strides = [1, 1, 1, 1]} : vector<2x4x8x8xf32> to vector<2x1x8x8xf32>
    %133 = vector.shape_cast %132 : vector<2x1x8x8xf32> to vector<2x8x8xf32>
    %134 = vector.shape_cast %133 : vector<2x8x8xf32> to vector<16x8xf32>
    %135 = arith.truncf %134 : vector<16x8xf32> to vector<16x8xbf16>
    %c2 = arith.constant 2 : index
    %c0_36 = arith.constant 0 : index
    %c0_37 = arith.constant 0 : index
    %136 = vector.load %arg6[%c2, %c0_36, %c0_37] : memref<4x8x32xbf16, #tpu.memory_space<vmem>>, vector<1x8x32xbf16>
    %137 = vector.shape_cast %136 : vector<1x8x32xbf16> to vector<8x32xbf16>
    %cst_38 = arith.constant dense<0.000000e+00> : vector<16x32xf32>
    %138 = tpu.matmul %135, %137, %cst_38 {dimension_numbers = #tpu.dot_dimension_numbers<[1], [0], [0], [1], [0, 0, 1, 1], [], []>} : vector<16x8xbf16>, vector<8x32xbf16>, vector<16x32xf32> -> vector<16x32xf32>
    %139 = arith.addf %131, %138 : vector<16x32xf32>
    %140 = vector.extract_strided_slice %116 {offsets = [0, 3, 0, 0], sizes = [2, 1, 8, 8], strides = [1, 1, 1, 1]} : vector<2x4x8x8xf32> to vector<2x1x8x8xf32>
    %141 = vector.shape_cast %140 : vector<2x1x8x8xf32> to vector<2x8x8xf32>
    %142 = vector.shape_cast %141 : vector<2x8x8xf32> to vector<16x8xf32>
    %143 = arith.truncf %142 : vector<16x8xf32> to vector<16x8xbf16>
    %c3 = arith.constant 3 : index
    %c0_39 = arith.constant 0 : index
    %c0_40 = arith.constant 0 : index
    %144 = vector.load %arg6[%c3, %c0_39, %c0_40] : memref<4x8x32xbf16, #tpu.memory_space<vmem>>, vector<1x8x32xbf16>
    %145 = vector.shape_cast %144 : vector<1x8x32xbf16> to vector<8x32xbf16>
    %cst_41 = arith.constant dense<0.000000e+00> : vector<16x32xf32>
    %146 = tpu.matmul %143, %145, %cst_41 {dimension_numbers = #tpu.dot_dimension_numbers<[1], [0], [0], [1], [0, 0, 1, 1], [], []>} : vector<16x8xbf16>, vector<8x32xbf16>, vector<16x32xf32> -> vector<16x32xf32>
    %147 = arith.addf %139, %146 : vector<16x32xf32>
    %c0_42 = arith.constant 0 : index
    %c0_43 = arith.constant 0 : index
    %148 = vector.load %arg7[%c0_42, %c0_43] : memref<1x32xf32, #tpu.memory_space<vmem>>, vector<1x32xf32>
    %149 = vector.broadcast %148 : vector<1x32xf32> to vector<16x32xf32>
    %150 = arith.addf %147, %149 : vector<16x32xf32>
    %151 = arith.addf %1, %150 : vector<16x32xf32>
    %cst_44 = arith.constant dense<0.000000e+00> : vector<16xf32>
    %152 = vector.multi_reduction <add>, %151, %cst_44 [1] : vector<16x32xf32> to vector<16xf32>
    %153 = vector.shape_cast %152 : vector<16xf32> to vector<16x1xf32>
    %cst_45 = arith.constant 3.200000e+01 : f32
    %154 = vector.broadcast %cst_45 : f32 to vector<16x1xf32>
    %155 = arith.divf %153, %154 : vector<16x1xf32>
    %156 = arith.mulf %151, %151 : vector<16x32xf32>
    %cst_46 = arith.constant dense<0.000000e+00> : vector<16xf32>
    %157 = vector.multi_reduction <add>, %156, %cst_46 [1] : vector<16x32xf32> to vector<16xf32>
    %158 = vector.shape_cast %157 : vector<16xf32> to vector<16x1xf32>
    %cst_47 = arith.constant 3.200000e+01 : f32
    %159 = vector.broadcast %cst_47 : f32 to vector<16x1xf32>
    %160 = arith.divf %158, %159 : vector<16x1xf32>
    %161 = arith.mulf %155, %155 : vector<16x1xf32>
    %162 = arith.subf %160, %161 : vector<16x1xf32>
    %163 = vector.broadcast %155 : vector<16x1xf32> to vector<16x32xf32>
    %164 = arith.subf %151, %163 : vector<16x32xf32>
    %cst_48 = arith.constant 9.99999974E-6 : f32
    %165 = vector.broadcast %cst_48 : f32 to vector<16x1xf32>
    %166 = arith.addf %162, %165 : vector<16x1xf32>
    %167 = math.rsqrt %166 : vector<16x1xf32>
    %168 = vector.broadcast %167 : vector<16x1xf32> to vector<16x32xf32>
    %169 = arith.mulf %164, %168 : vector<16x32xf32>
    %c0_49 = arith.constant 0 : index
    %c0_50 = arith.constant 0 : index
    %170 = vector.load %arg8[%c0_49, %c0_50] : memref<1x32xf32, #tpu.memory_space<vmem>>, vector<1x32xf32>
    %171 = vector.broadcast %170 : vector<1x32xf32> to vector<16x32xf32>
    %172 = arith.mulf %169, %171 : vector<16x32xf32>
    %c0_51 = arith.constant 0 : index
    %c0_52 = arith.constant 0 : index
    %173 = vector.load %arg9[%c0_51, %c0_52] : memref<1x32xf32, #tpu.memory_space<vmem>>, vector<1x32xf32>
    %174 = vector.broadcast %173 : vector<1x32xf32> to vector<16x32xf32>
    %175 = arith.addf %172, %174 : vector<16x32xf32>
    %176 = arith.truncf %175 : vector<16x32xf32> to vector<16x32xbf16>
    %c0_53 = arith.constant 0 : index
    %c0_54 = arith.constant 0 : index
    %177 = vector.load %arg10[%c0_53, %c0_54] : memref<32x128xbf16, #tpu.memory_space<vmem>>, vector<32x128xbf16>
    %cst_55 = arith.constant dense<0.000000e+00> : vector<16x128xf32>
    %178 = tpu.matmul %176, %177, %cst_55 {dimension_numbers = #tpu.dot_dimension_numbers<[1], [0], [0], [1], [0, 0, 1, 1], [], []>} : vector<16x32xbf16>, vector<32x128xbf16>, vector<16x128xf32> -> vector<16x128xf32>
    %c0_56 = arith.constant 0 : index
    %c0_57 = arith.constant 0 : index
    %179 = vector.load %arg11[%c0_56, %c0_57] : memref<1x128xf32, #tpu.memory_space<vmem>>, vector<1x128xf32>
    %180 = vector.broadcast %179 : vector<1x128xf32> to vector<16x128xf32>
    %181 = arith.addf %178, %180 : vector<16x128xf32>
    %182 = arith.mulf %181, %181 : vector<16x128xf32>
    %183 = arith.mulf %181, %182 : vector<16x128xf32>
    %cst_58 = arith.constant 4.471500e-02 : f32
    %184 = vector.broadcast %cst_58 : f32 to vector<16x128xf32>
    %185 = arith.mulf %184, %183 : vector<16x128xf32>
    %186 = arith.addf %181, %185 : vector<16x128xf32>
    %cst_59 = arith.constant 0.797884583 : f32
    %187 = vector.broadcast %cst_59 : f32 to vector<16x128xf32>
    %188 = arith.mulf %187, %186 : vector<16x128xf32>
    %189 = math.tanh %188 : vector<16x128xf32>
    %cst_60 = arith.constant 1.000000e+00 : f32
    %190 = vector.broadcast %cst_60 : f32 to vector<16x128xf32>
    %191 = arith.addf %190, %189 : vector<16x128xf32>
    %cst_61 = arith.constant 5.000000e-01 : f32
    %192 = vector.broadcast %cst_61 : f32 to vector<16x128xf32>
    %193 = arith.mulf %192, %191 : vector<16x128xf32>
    %194 = arith.mulf %181, %193 : vector<16x128xf32>
    %195 = arith.truncf %194 : vector<16x128xf32> to vector<16x128xbf16>
    %c0_62 = arith.constant 0 : index
    %c0_63 = arith.constant 0 : index
    %196 = vector.load %arg12[%c0_62, %c0_63] : memref<128x32xbf16, #tpu.memory_space<vmem>>, vector<128x32xbf16>
    %cst_64 = arith.constant dense<0.000000e+00> : vector<16x32xf32>
    %197 = tpu.matmul %195, %196, %cst_64 {dimension_numbers = #tpu.dot_dimension_numbers<[1], [0], [0], [1], [0, 0, 1, 1], [], []>} : vector<16x128xbf16>, vector<128x32xbf16>, vector<16x32xf32> -> vector<16x32xf32>
    %c0_65 = arith.constant 0 : index
    %c0_66 = arith.constant 0 : index
    %198 = vector.load %arg13[%c0_65, %c0_66] : memref<1x32xf32, #tpu.memory_space<vmem>>, vector<1x32xf32>
    %199 = vector.broadcast %198 : vector<1x32xf32> to vector<16x32xf32>
    %200 = arith.addf %197, %199 : vector<16x32xf32>
    %201 = arith.addf %151, %200 : vector<16x32xf32>
    %202 = vector.shape_cast %201 : vector<16x32xf32> to vector<2x8x32xf32>
    %c0_67 = arith.constant 0 : index
    %c0_68 = arith.constant 0 : index
    %c0_69 = arith.constant 0 : index
    %203 = vector.load %arg14[%c0_67, %c0_68, %c0_69] : memref<2x8x32xf32, #tpu.memory_space<vmem>>, vector<2x8x32xf32>
    tpu.vector_store %arg14[%c0_67, %c0_68, %c0_69], %202 {strides = array<i32>} : memref<2x8x32xf32, #tpu.memory_space<vmem>>, vector<2x8x32xf32>,
    return
  }
  func.func @transform_0(%arg0: i32) -> (i32, i32, i32) {
    %c0_i32 = arith.constant 0 : i32
    %c0_i32_0 = arith.constant 0 : i32
    %c0_i32_1 = arith.constant 0 : i32
    return %arg0, %c0_i32, %c0_i32_0 : i32, i32, i32
  }
  func.func @transform_1(%arg0: i32) -> (i32, i32, i32) {
    %c0_i32 = arith.constant 0 : i32
    %c0_i32_0 = arith.constant 0 : i32
    %c0_i32_1 = arith.constant 0 : i32
    return %arg0, %c0_i32, %c0_i32_0 : i32, i32, i32
  }
  func.func @transform_2(%arg0: i32) -> (i32, i32) {
    %c0_i32 = arith.constant 0 : i32
    %c0_i32_0 = arith.constant 0 : i32
    %c0_i32_1 = arith.constant 0 : i32
    return %c0_i32, %c0_i32_0 : i32, i32
  }
  func.func @transform_3(%arg0: i32) -> (i32, i32) {
    %c0_i32 = arith.constant 0 : i32
    %c0_i32_0 = arith.constant 0 : i32
    %c0_i32_1 = arith.constant 0 : i32
    return %c0_i32, %c0_i32_0 : i32, i32
  }
  func.func @transform_4(%arg0: i32) -> (i32, i32) {
    %c0_i32 = arith.constant 0 : i32
    %c0_i32_0 = arith.constant 0 : i32
    %c0_i32_1 = arith.constant 0 : i32
    return %c0_i32, %c0_i32_0 : i32, i32
  }
  func.func @transform_5(%arg0: i32) -> (i32, i32, i32) {
    %c0_i32 = arith.constant 0 : i32
    %c0_i32_0 = arith.constant 0 : i32
    %c0_i32_1 = arith.constant 0 : i32
    %c0_i32_2 = arith.constant 0 : i32
    return %c0_i32, %c0_i32_0, %c0_i32_1 : i32, i32, i32
  }
  func.func @transform_6(%arg0: i32) -> (i32, i32) {
    %c0_i32 = arith.constant 0 : i32
    %c0_i32_0 = arith.constant 0 : i32
    %c0_i32_1 = arith.constant 0 : i32
    return %c0_i32, %c0_i32_0 : i32, i32
  }
  func.func @transform_7(%arg0: i32) -> (i32, i32) {
    %c0_i32 = arith.constant 0 : i32
    %c0_i32_0 = arith.constant 0 : i32
    %c0_i32_1 = arith.constant 0 : i32
    return %c0_i32, %c0_i32_0 : i32, i32
  }
  func.func @transform_8(%arg0: i32) -> (i32, i32) {
    %c0_i32 = arith.constant 0 : i32
    %c0_i32_0 = arith.constant 0 : i32
    %c0_i32_1 = arith.constant 0 : i32
    return %c0_i32, %c0_i32_0 : i32, i32
  }
  func.func @transform_9(%arg0: i32) -> (i32, i32) {
    %c0_i32 = arith.constant 0 : i32
    %c0_i32_0 = arith.constant 0 : i32
    %c0_i32_1 = arith.constant 0 : i32
    return %c0_i32, %c0_i32_0 : i32, i32
  }
  func.func @transform_10(%arg0: i32) -> (i32, i32) {
    %c0_i32 = arith.constant 0 : i32
    %c0_i32_0 = arith.constant 0 : i32
    %c0_i32_1 = arith.constant 0 : i32
    return %c0_i32, %c0_i32_0 : i32, i32
  }
  func.func @transform_11(%arg0: i32) -> (i32, i32) {
    %c0_i32 = arith.constant 0 : i32
    %c0_i32_0 = arith.constant 0 : i32
    %c0_i32_1 = arith.constant 0 : i32
    return %c0_i32, %c0_i32_0 : i32, i32
  }
  func.func @transform_12(%arg0: i32) -> (i32, i32) {
    %c0_i32 = arith.constant 0 : i32
    %c0_i32_0 = arith.constant 0 : i32
    %c0_i32_1 = arith.constant 0 : i32
    return %c0_i32, %c0_i32_0 : i32, i32
  }
  func.func @transform_13(%arg0: i32) -> (i32, i32, i32) {
    %c0_i32 = arith.constant 0 : i32
    %c0_i32_0 = arith.constant 0 : i32
    %c0_i32_1 = arith.constant 0 : i32
    return %arg0, %c0_i32, %c0_i32_0 : i32, i32, i32
  }
  func.func @transform_14(%arg0: i32) -> (i32, i32, i32, i32) {
    %c0_i32 = arith.constant 0 : i32
    %c0_i32_0 = arith.constant 0 : i32
    %c0_i32_1 = arith.constant 0 : i32
    %c0_i32_2 = arith.constant 0 : i32
    return %arg0, %c0_i32, %c0_i32_0, %c0_i32_1 : i32, i32, i32, i32
  }
}

</mosaic_0001>

<bundles_post_ra>
// kernel: tpu_custom_call.1
= control target key start
LH: loop header
LB: loop body
LE: loop exit
PB: predicated region body
PF: predicated region fallthrough
CT: control target
= control target key end

     0   :  { %20 = vsyncpa [#allocation3], 0  ;;  %s3119_s0 = inlined_call_operand.hbm [shape: f32[2,8,32], index: 0, kind: input, shape index: {}]   ;;  %s3120_s1 = inlined_call_operand.hbm [shape: f32[2,1,8], index: 1, kind: input, shape index: {}]   ;;  %s3121_s2 = inlined_call_operand.hbm [shape: f32[1,32], index: 2, kind: input, shape index: {}]   ;;  %s3122_s3 = inlined_call_operand.hbm [shape: f32[1,32], index: 3, kind: input, shape index: {}]   ;;  %s3123_s4 = inlined_call_operand.hbm [shape: bf16[32,96], index: 4, kind: input, shape index: {}]   ;;  %s3124_s5 = inlined_call_operand.hbm [shape: bf16[4,8,32], index: 5, kind: input, shape index: {}]   ;;  %s3125_s6 = inlined_call_operand.hbm [shape: f32[1,32], index: 6, kind: input, shape index: {}]   ;;  %s3126_s7 = inlined_call_operand.hbm [shape: f32[1,32], index: 7, kind: input, shape index: {}]   ;;  %s3127_s8 = inlined_call_operand.hbm [shape: f32[1,32], index: 8, kind: input, shape index: {}]   ;;  %s3128_s9 = inlined_call_operand.hbm [shape: bf16[32,128], index: 9, kind: input, shape index: {}]   ;;  %s3129_s10 = inlined_call_operand.hbm [shape: f32[1,128], index: 10, kind: input, shape index: {}]   ;;  %s3130_s11 = inlined_call_operand.hbm [shape: bf16[128,32], index: 11, kind: input, shape index: {}]   ;;  %s3131_s12 = inlined_call_operand.hbm [shape: f32[1,32], index: 12, kind: input, shape index: {}]   ;;  %s3132_s13 = inlined_call_operand.hbm [shape: f32[2,8,32], index: 13, kind: output, shape index: {0}]   ;;  %s3133_s14 = inlined_call_operand.hbm [shape: f32[2,4,8,8], index: 14, kind: output, shape index: {1}]  }
   0x1   :  { %21 = vsyncpa [#allocation6], 0 }
   0x2   :  { %22 = vsyncpa [#allocation9], 0 }
   0x3   :  { %23 = vsyncpa [#allocation12], 0 }
   0x4   :  { %24 = vsyncpa [#allocation15], 0 }
   0x5   :  { %25 = vsyncpa [#allocation18], 0 }
   0x6   :  { %26 = vsyncpa [#allocation21], 0 }
   0x7   :  { %27 = vsyncpa [#allocation4], 0 }
   0x8   :  { %28 = vsyncpa [#allocation25], 0  ;;  %s2526_s29 = smov [#allocation5]   ;;  %s2178_s17 = scalar_lea.hbm %s3120_s1, 32 }
   0x9   :  { %s46_s30 = sshll.u32 %s2526_s29, 4  ;;  %p2179_p0 = scmp.ne.s32.totalorder %s3120_s1, %s2178_s17  ;;  %s47_s30 = int_to_ptr.vmem [resolvable:$true] %s46_s30 }
   0xa   :  { %p2182_p1 = scmp.lt.u32.totalorder %s2178_s17, %s3120_s1 }
   0xc   :  { %p2184_p2 = pnand %p2182_p1, %p2179_p0 }
   0xe   :  { %2187 = shalt.err (!%p2184_p2)
}
   0xf   :  { %s2188_s22 = scalar_lea.vmem %s47_s30, 32  ;;  %p2193_p4 = scmp.lt.s32.totalorder %s47_s30, %s47_s30 }
  0x10   :  { %p2189_p3 = scmp.ne.s32.totalorder %s47_s30, %s2188_s22  ;;  %p2194_p5 = scmp.lt.s32.totalorder %s2188_s22, %s2188_s22 }
  0x12   :  { %p2195_p6 = por %p2194_p5, %p2193_p4 }
  0x14   :  { %p2196_p7 = pnand %p2195_p6, %p2189_p3 }
  0x16   :  { %2199 = shalt.err (!%p2196_p7)
}
  0x17   :  { %s2527_s23 = smov 16   ;;  %s2528_s24 = smov 1  }
  0x18   :  { %52 = dma.hbm_to_vmem [thread:$0]  %s3120_s1, 32, %s47_s30, [#allocation6], %s2527_s23, %s2527_s23, %s2528_s24  }
  0x19   :  { %s2529_s27 = smov [#allocation8]   ;;  %s2200_s16 = scalar_lea.hbm %s3122_s3, 16 }
  0x1a   :  { %s69_s28 = sshll.u32 %s2529_s27, 4  ;;  %p2201_p8 = scmp.ne.s32.totalorder %s3122_s3, %s2200_s16  ;;  %s70_s28 = int_to_ptr.vmem [resolvable:$true] %s69_s28 }
  0x1b   :  { %p2204_p9 = scmp.lt.u32.totalorder %s2200_s16, %s3122_s3 }
  0x1d   :  { %p2206_p10 = pnand %p2204_p9, %p2201_p8 }
  0x1f   :  { %2209 = shalt.err (!%p2206_p10)
}
  0x20   :  { %s2210_s21 = scalar_lea.vmem %s70_s28, 16  ;;  %s2214_s1 = scalar_lea.vmem %s70_s28, 32 }
  0x21   :  { %p2211_p11 = scmp.ne.s32.totalorder %s70_s28, %s2210_s21  ;;  %p2215_p12 = scmp.lt.s32.totalorder %s70_s28, %s70_s28 }
  0x22   :  { %p2216_p13 = scmp.lt.s32.totalorder %s2214_s1, %s2210_s21 }
  0x24   :  { %p2217_p0 = por %p2216_p13, %p2215_p12 }
  0x26   :  { %p2218_p1 = pnand %p2217_p0, %p2211_p11 }
  0x28   :  { %2221 = shalt.err (!%p2218_p1)
}
  0x29   :  { %72 = dma.hbm_to_vmem [thread:$0]  %s3122_s3, 16, %s70_s28, [#allocation9]  }
  0x2a   :  { %s2530_s23 = smov [#allocation11]   ;;  %s2531_s25 = smov [#allocation14]  }
  0x2b   :  { %s90_s24 = sshll.u32 %s2530_s23, 4  ;;  %s113_s26 = sshll.u32 %s2531_s25, 4  ;;  %s91_s24 = int_to_ptr.vmem [resolvable:$true] %s90_s24  ;;  %s2652_s26 = int_to_ptr.vmem [resolvable:$true] %s113_s26 }
  0x2c   :  { %s2222_s15 = scalar_lea.hbm %s3124_s5, 256 }
  0x2d   :  { %p2223_p2 = scmp.ne.s32.totalorder %s3124_s5, %s2222_s15  ;;  %p2226_p3 = scmp.lt.u32.totalorder %s2222_s15, %s3124_s5 }
  0x2f   :  { %p2228_p4 = pnand %p2226_p3, %p2223_p2 }
  0x31   :  { %2231 = shalt.err (!%p2228_p4)
}
  0x32   :  { %s2232_s3 = scalar_lea.vmem %s91_s24, 256  ;;  %p2237_p6 = scmp.lt.s32.totalorder %s91_s24, %s91_s24 }
  0x33   :  { %p2233_p5 = scmp.ne.s32.totalorder %s91_s24, %s2232_s3  ;;  %p2238_p7 = scmp.lt.s32.totalorder %s2232_s3, %s2232_s3 }
  0x35   :  { %p2239_p8 = por %p2238_p7, %p2237_p6 }
  0x37   :  { %p2240_p9 = pnand %p2239_p8, %p2233_p5 }
  0x39   :  { %2243 = shalt.err (!%p2240_p9)
}
  0x3a   :  { %s2532_s28 = smov 64   ;;  %s2533_s20 = smov 4  }
  0x3b   :  { %96 = dma.hbm_to_vmem [thread:$0]  %s3124_s5, 256, %s91_s24, [#allocation12], %s2532_s28, %s2532_s28, %s2533_s20  }
  0x3c   :  { %s2244_s23 = scalar_lea.hbm %s3126_s7, 16 }
  0x3d   :  { %p2245_p10 = scmp.ne.s32.totalorder %s3126_s7, %s2244_s23  ;;  %p2248_p11 = scmp.lt.u32.totalorder %s2244_s23, %s3126_s7 }
  0x3f   :  { %p2250_p12 = pnand %p2248_p11, %p2245_p10 }
  0x41   :  { %2253 = shalt.err (!%p2250_p12)
}
  0x42   :  { %s2254_s16 = scalar_lea.vmem %s2652_s26, 16  ;;  %s2258_s5 = scalar_lea.vmem %s2652_s26, 32 }
  0x43   :  { %p2255_p13 = scmp.ne.s32.totalorder %s2652_s26, %s2254_s16  ;;  %p2259_p0 = scmp.lt.s32.totalorder %s2652_s26, %s2652_s26 }
  0x44   :  { %p2260_p1 = scmp.lt.s32.totalorder %s2258_s5, %s2254_s16 }
  0x46   :  { %p2261_p2 = por %p2260_p1, %p2259_p0 }
  0x48   :  { %p2262_p3 = pnand %p2261_p2, %p2255_p13 }
  0x4a   :  { %2265 = shalt.err (!%p2262_p3)
}
  0x4b   :  { %116 = dma.hbm_to_vmem [thread:$0]  %s3126_s7, 16, %s2652_s26, [#allocation15]  }
  0x4c   :  { %s2534_s18 = smov [#allocation17]   ;;  %s2535_s3 = smov [#allocation20]  }
  0x4d   :  { %s132_s19 = sshll.u32 %s2534_s18, 4  ;;  %s154_s21 = sshll.u32 %s2535_s3, 4  ;;  %s133_s19 = int_to_ptr.vmem [resolvable:$true] %s132_s19  ;;  %s2687_s21 = int_to_ptr.vmem [resolvable:$true] %s154_s21 }
  0x4e   :  { %s2266_s22 = scalar_lea.hbm %s3128_s9, 256 }
  0x4f   :  { %p2267_p4 = scmp.ne.s32.totalorder %s3128_s9, %s2266_s22  ;;  %p2270_p5 = scmp.lt.u32.totalorder %s2266_s22, %s3128_s9 }
  0x51   :  { %p2272_p6 = pnand %p2270_p5, %p2267_p4 }
  0x53   :  { %2275 = shalt.err (!%p2272_p6)
}
  0x54   :  { %s2276_s7 = scalar_lea.vmem %s133_s19, 256  ;;  %p2281_p8 = scmp.lt.s32.totalorder %s133_s19, %s133_s19 }
  0x55   :  { %p2277_p7 = scmp.ne.s32.totalorder %s133_s19, %s2276_s7  ;;  %p2282_p9 = scmp.lt.s32.totalorder %s2276_s7, %s2276_s7 }
  0x57   :  { %p2283_p10 = por %p2282_p9, %p2281_p8 }
  0x59   :  { %p2284_p11 = pnand %p2283_p10, %p2277_p7 }
  0x5b   :  { %2287 = shalt.err (!%p2284_p11)
}
  0x5c   :  { %138 = dma.hbm_to_vmem [thread:$0]  %s3128_s9, 256, %s133_s19, [#allocation18], %s2532_s28, %s2532_s28, %s2533_s20  }
  0x5d   :  { %s2288_s24 = scalar_lea.hbm %s3130_s11, 1024 }
  0x5e   :  { %p2289_p12 = scmp.ne.s32.totalorder %s3130_s11, %s2288_s24  ;;  %p2292_p13 = scmp.lt.u32.totalorder %s2288_s24, %s3130_s11 }
  0x60   :  { %p2294_p0 = pnand %p2292_p13, %p2289_p12 }
  0x62   :  { %2297 = shalt.err (!%p2294_p0)
}
  0x63   :  { %s2298_s30 = scalar_lea.vmem %s2687_s21, 1024  ;;  %p2303_p2 = scmp.lt.s32.totalorder %s2687_s21, %s2687_s21 }
  0x64   :  { %p2299_p1 = scmp.ne.s32.totalorder %s2687_s21, %s2298_s30  ;;  %p2304_p3 = scmp.lt.s32.totalorder %s2298_s30, %s2298_s30 }
  0x66   :  { %p2305_p4 = por %p2304_p3, %p2303_p2 }
  0x68   :  { %p2306_p5 = pnand %p2305_p4, %p2299_p1 }
  0x6a   :  { %2309 = shalt.err (!%p2306_p5)
}
  0x6b   :  { %160 = dma.hbm_to_vmem [thread:$0]  %s3130_s11, 1024, %s2687_s21, [#allocation21], %s2532_s28, %s2532_s28, %s2533_s20  }
  0x6c   :  { %s2536_s22 = smov [#allocation2]   ;;  %s2310_s29 = scalar_lea.hbm %s3119_s0, 256 }
  0x6d   :  { %s34_s23 = sshll.u32 %s2536_s22, 4  ;;  %p2311_p6 = scmp.ne.s32.totalorder %s3119_s0, %s2310_s29  ;;  %s35_s23 = int_to_ptr.vmem [resolvable:$true] %s34_s23 }
  0x6e   :  { %p2314_p7 = scmp.lt.u32.totalorder %s2310_s29, %s3119_s0 }
  0x70   :  { %p2316_p8 = pnand %p2314_p7, %p2311_p6 }
  0x72   :  { %2319 = shalt.err (!%p2316_p8)
}
  0x73   :  { %s2320_s5 = scalar_lea.vmem %s35_s23, 256  ;;  %p2325_p10 = scmp.lt.s32.totalorder %s35_s23, %s35_s23 }
  0x74   :  { %p2321_p9 = scmp.ne.s32.totalorder %s35_s23, %s2320_s5  ;;  %p2326_p11 = scmp.lt.s32.totalorder %s2320_s5, %s2320_s5 }
  0x76   :  { %p2327_p12 = por %p2326_p11, %p2325_p10 }
  0x78   :  { %p2328_p13 = pnand %p2327_p12, %p2321_p9 }
  0x7a   :  { %2331 = shalt.err (!%p2328_p13)
}
  0x7b   :  { %s2537_s11 = smov 128   ;;  %s2538_s21 = smov 8  }
  0x7c   :  { %40 = dma.hbm_to_vmem [thread:$0]  %s3119_s0, 256, %s35_s23, [#allocation3], %s2537_s11, %s2537_s11, %s2538_s21  }
  0x7d   :  { %s2539_s18 = smov [#allocation7]   ;;  %s2540_s1 = smov [#allocation10]  }
  0x7e   :  { %s59_s3 = sshll.u32 %s2539_s18, 4  ;;  %s78_s30 = sshll.u32 %s2540_s1, 4  ;;  %s60_s3 = int_to_ptr.vmem [resolvable:$true] %s59_s3  ;;  %s79_s30 = int_to_ptr.vmem [resolvable:$true] %s78_s30 }
  0x7f   :  { %s2332_s22 = scalar_lea.hbm %s3121_s2, 16 }
  0x80   :  { %p2333_p0 = scmp.ne.s32.totalorder %s3121_s2, %s2332_s22  ;;  %p2336_p1 = scmp.lt.u32.totalorder %s2332_s22, %s3121_s2 }
  0x82   :  { %p2338_p2 = pnand %p2336_p1, %p2333_p0 }
  0x84   :  { %2341 = shalt.err (!%p2338_p2)
}
  0x85   :  { %s2342_s0 = scalar_lea.vmem %s60_s3, 16  ;;  %s2346_s23 = scalar_lea.vmem %s60_s3, 32 }
  0x86   :  { %p2343_p3 = scmp.ne.s32.totalorder %s60_s3, %s2342_s0  ;;  %p2347_p4 = scmp.lt.s32.totalorder %s60_s3, %s60_s3 }
  0x87   :  { %p2348_p5 = scmp.lt.s32.totalorder %s2346_s23, %s2342_s0 }
  0x89   :  { %p2349_p6 = por %p2348_p5, %p2347_p4 }
  0x8b   :  { %p2350_p7 = pnand %p2349_p6, %p2343_p3 }
  0x8d   :  { %2353 = shalt.err (!%p2350_p7)
}
  0x8e   :  { %62 = dma.hbm_to_vmem [thread:$0]  %s3121_s2, 16, %s60_s3, [#allocation6]  }
  0x8f   :  { %s2354_s24 = scalar_lea.hbm %s3123_s4, 256 }
  0x90   :  { %p2355_p8 = scmp.ne.s32.totalorder %s3123_s4, %s2354_s24  ;;  %p2358_p9 = scmp.lt.u32.totalorder %s2354_s24, %s3123_s4 }
  0x92   :  { %p2360_p10 = pnand %p2358_p9, %p2355_p8 }
  0x94   :  { %2363 = shalt.err (!%p2360_p10)
}
  0x95   :  { %s2364_s19 = scalar_lea.vmem %s79_s30, 256  ;;  %p2369_p12 = scmp.lt.s32.totalorder %s79_s30, %s79_s30 }
  0x96   :  { %p2365_p11 = scmp.ne.s32.totalorder %s79_s30, %s2364_s19  ;;  %p2370_p13 = scmp.lt.s32.totalorder %s2364_s19, %s2364_s19 }
  0x98   :  { %p2371_p0 = por %p2370_p13, %p2369_p12 }
  0x9a   :  { %p2372_p1 = pnand %p2371_p0, %p2365_p11 }
  0x9c   :  { %2375 = shalt.err (!%p2372_p1)
}
  0x9d   :  { %84 = dma.hbm_to_vmem [thread:$0]  %s3123_s4, 256, %s79_s30, [#allocation9], %s2532_s28, %s2532_s28, %s2533_s20  }
  0x9e   :  { %s2541_s22 = smov [#allocation13]   ;;  %s2542_s27 = smov [#allocation16]  }
  0x9f   :  { %s103_s25 = sshll.u32 %s2541_s22, 4  ;;  %s123_s29 = sshll.u32 %s2542_s27, 4  ;;  %s104_s25 = int_to_ptr.vmem [resolvable:$true] %s103_s25  ;;  %s124_s29 = int_to_ptr.vmem [resolvable:$true] %s123_s29 }
  0xa0   :  { %s2376_s23 = scalar_lea.hbm %s3125_s6, 16 }
  0xa1   :  { %p2377_p2 = scmp.ne.s32.totalorder %s3125_s6, %s2376_s23  ;;  %p2380_p3 = scmp.lt.u32.totalorder %s2376_s23, %s3125_s6 }
  0xa3   :  { %p2382_p4 = pnand %p2380_p3, %p2377_p2 }
  0xa5   :  { %2385 = shalt.err (!%p2382_p4)
}
  0xa6   :  { %s2386_s4 = scalar_lea.vmem %s104_s25, 16  ;;  %s2390_s20 = scalar_lea.vmem %s104_s25, 32 }
  0xa7   :  { %p2387_p5 = scmp.ne.s32.totalorder %s104_s25, %s2386_s4  ;;  %p2391_p6 = scmp.lt.s32.totalorder %s104_s25, %s104_s25 }
  0xa8   :  { %p2392_p7 = scmp.lt.s32.totalorder %s2390_s20, %s2386_s4 }
  0xaa   :  { %p2393_p8 = por %p2392_p7, %p2391_p6 }
  0xac   :  { %p2394_p9 = pnand %p2393_p8, %p2387_p5 }
  0xae   :  { %2397 = shalt.err (!%p2394_p9)
}
  0xaf   :  { %106 = dma.hbm_to_vmem [thread:$0]  %s3125_s6, 16, %s104_s25, [#allocation12]  }
  0xb0   :  { %s2398_s1 = scalar_lea.hbm %s3127_s8, 16 }
  0xb1   :  { %p2399_p10 = scmp.ne.s32.totalorder %s3127_s8, %s2398_s1  ;;  %p2402_p11 = scmp.lt.u32.totalorder %s2398_s1, %s3127_s8 }
  0xb3   :  { %p2404_p12 = pnand %p2402_p11, %p2399_p10 }
  0xb5   :  { %2407 = shalt.err (!%p2404_p12)
}
  0xb6   :  { %s2408_s22 = scalar_lea.vmem %s124_s29, 16  ;;  %s2412_s27 = scalar_lea.vmem %s124_s29, 32 }
  0xb7   :  { %p2409_p13 = scmp.ne.s32.totalorder %s124_s29, %s2408_s22  ;;  %p2413_p0 = scmp.lt.s32.totalorder %s124_s29, %s124_s29 }
  0xb8   :  { %p2414_p1 = scmp.lt.s32.totalorder %s2412_s27, %s2408_s22 }
  0xba   :  { %p2415_p2 = por %p2414_p1, %p2413_p0 }
  0xbc   :  { %p2416_p3 = pnand %p2415_p2, %p2409_p13 }
  0xbe   :  { %2419 = shalt.err (!%p2416_p3)
}
  0xbf   :  { %126 = dma.hbm_to_vmem [thread:$0]  %s3127_s8, 16, %s124_s29, [#allocation15]  }
  0xc0   :  { %s2543_s7 = smov [#allocation19]   ;;  %s2544_s23 = smov [#allocation22]  }
  0xc1   :  { %s145_s0 = sshll.u32 %s2543_s7, 4  ;;  %s167_s26 = sshll.u32 %s2544_s23, 4  ;;  %s146_s0 = int_to_ptr.vmem [resolvable:$true] %s145_s0  ;;  %s168_s26 = int_to_ptr.vmem [resolvable:$true] %s167_s26 }
  0xc2   :  { %s2420_s5 = scalar_lea.hbm %s3129_s10, 16 }
  0xc3   :  { %p2421_p4 = scmp.ne.s32.totalorder %s3129_s10, %s2420_s5  ;;  %p2424_p5 = scmp.lt.u32.totalorder %s2420_s5, %s3129_s10 }
  0xc5   :  { %p2426_p6 = pnand %p2424_p5, %p2421_p4 }
  0xc7   :  { %2429 = shalt.err (!%p2426_p6)
}
  0xc8   :  { %s2430_s8 = scalar_lea.vmem %s146_s0, 16  ;;  %s2434_s29 = scalar_lea.vmem %s146_s0, 32 }
  0xc9   :  { %p2431_p7 = scmp.ne.s32.totalorder %s146_s0, %s2430_s8  ;;  %p2435_p8 = scmp.lt.s32.totalorder %s146_s0, %s146_s0 }
  0xca   :  { %p2436_p9 = scmp.lt.s32.totalorder %s2434_s29, %s2430_s8 }
  0xcc   :  { %p2437_p10 = por %p2436_p9, %p2435_p8 }
  0xce   :  { %p2438_p11 = pnand %p2437_p10, %p2431_p7 }
  0xd0   :  { %2441 = shalt.err (!%p2438_p11)
}
  0xd1   :  { %148 = dma.hbm_to_vmem [thread:$0]  %s3129_s10, 16, %s146_s0, [#allocation18]  }
  0xd2   :  { %s2442_s19 = scalar_lea.hbm %s3131_s12, 16 }
  0xd3   :  { %p2443_p12 = scmp.ne.s32.totalorder %s3131_s12, %s2442_s19  ;;  %p2446_p13 = scmp.lt.u32.totalorder %s2442_s19, %s3131_s12 }
  0xd5   :  { %p2448_p0 = pnand %p2446_p13, %p2443_p12 }
  0xd7   :  { %2451 = shalt.err (!%p2448_p0)
}
  0xd8   :  { %s2452_s6 = scalar_lea.vmem %s168_s26, 16  ;;  %s2456_s25 = scalar_lea.vmem %s168_s26, 32 }
  0xd9   :  { %p2453_p1 = scmp.ne.s32.totalorder %s168_s26, %s2452_s6  ;;  %p2457_p2 = scmp.lt.s32.totalorder %s168_s26, %s168_s26 }
  0xda   :  { %p2458_p3 = scmp.lt.s32.totalorder %s2456_s25, %s2452_s6 }
  0xdc   :  { %p2459_p4 = por %p2458_p3, %p2457_p2 }
  0xde   :  { %p2460_p5 = pnand %p2459_p4, %p2453_p1 }
  0xe0   :  { %2463 = shalt.err (!%p2460_p5)
}
  0xe1   :  { %170 = dma.hbm_to_vmem [thread:$0]  %s3131_s12, 16, %s168_s26, [#allocation21]  }
  0xe2   :  { %2508 = dma.done.wait [#allocation3], 256  }
  0xe3   :  { %2509 = vsyncadd [#allocation3], 4294967040 }
  0xe4   :  { %2510 = dma.done.wait [#allocation6], 48  }
  0xe5   :  { %2511 = vsyncadd [#allocation6], 4294967248 }
  0xe6   :  { %2512 = dma.done.wait [#allocation9], 272  }
  0xe7   :  { %2513 = vsyncadd [#allocation9], 4294967024 }
  0xe8   :  { %2514 = dma.done.wait [#allocation12], 272  }
  0xe9   :  { %2515 = vsyncadd [#allocation12], 4294967024 }
  0xea   :  { %2516 = dma.done.wait [#allocation15], 32  }
  0xeb   :  { %2517 = vsyncadd [#allocation15], 4294967264 }
  0xec   :  { %2518 = dma.done.wait [#allocation18], 272  }
  0xed   :  { %2519 = vsyncadd [#allocation18], 4294967024 }
  0xee   :  { %2520 = dma.done.wait [#allocation21], 1040  }
  0xef   :  { %2521 = vsyncadd [#allocation21], 4294966256  ;;  %vm213_vm0 = vcmask 261120   ;;  %v211_v0 = vld [vmem:[#allocation2] sm:$0xff]  ;;  %v212_v1 = vld [vmem:[#allocation2 + $0x8] sm:$0xff]  ;;  %v2545_v9 = vmov 0.0  }
  0xf0   :  { %v214_v2 = vsel %vm213_vm0, %v211_v0, 0.0  ;;  %v223_v3 = vmul.f32 %v211_v0, %v211_v0  ;;  %v217_v4 = vsel %vm213_vm0, %v212_v1, 0.0  ;;  %v224_v5 = vmul.f32 %v212_v1, %v212_v1  ;;  %v2120_v8 = vld [vmem:[#allocation10] sm:$0xff]   ;;  %1937 = vmatprep.subr.bf16.mxu1 %v2545_v9  ;;  %v2121_v10 = vld [vmem:[#allocation10 + $0x8] sm:$0xff]   ;;  %1963 = vmatprep.subr.bf16.mxu0 %v2545_v9  ;;  %v1839_v28 = vld [vmem:[#allocation7] ss:$0 sm:$0xff] }
  0xf1   :  { %215 = vadd.xlane.f32.xlu0 %v214_v2  ;;  %vm2546_vm1 = vmmov 0   ;;  %1938 = vmatpush3.bf16.msra.mxu1 %v2120_v8  ;;  %v1840_v33 = vld [vmem:[#allocation8] ss:$0 sm:$0xff]  ;;  %s2547_s12 = smov 112   ;;  %s2548_s0 = smov 120   ;;  %vm385_vm2 = vcmask 64512  }
  0xf2   :  { %v225_v6 = vsel %vm213_vm0, %v223_v3, 0.0  ;;  %v228_v7 = vsel %vm213_vm0, %v224_v5, 0.0  ;;  %1941 = vmatprep.mubr.msk.bf16.mxu1 %vm2546_vm1, %v2545_v9  ;;  %1939 = vmatprep.subr.bf16.mxu1 %v2545_v9  ;;  %s2549_s23 = smov 104   ;;  %s2550_s26 = smov 96   ;;  %vm955_vm4 = vcmask 1043456  }
  0xf3   :  { %226 = vadd.xlane.f32.xlu1 %v225_v6  ;;  %1965 = vmatprep.mubr.msk.bf16.mxu0 %vm2546_vm1, %v2545_v9 }
  0xf5   :  { %218 = vadd.xlane.f32.xlu0 %v217_v4  ;;  %1940 = vmatpush3.bf16.msra.mxu1 %v2121_v10 }
  0xf6   :  { %1945 = vmatprep.subr.bf16.mxu1 %v2545_v9 }
  0xf7   :  { %229 = vadd.xlane.f32.xlu1 %v228_v7 }
 0x17e   :  { %v216_v11 = vpop.xlane.xlu0 %215 }
 0x17f   :  { %v221_v12 = vmul.f32 0.03125, %v216_v11 }
 0x180   :  { %v227_v13 = vpop.xlane.xlu1 %226 }
 0x181   :  { %v233_v14 = vmul.f32 %v221_v12, %v221_v12  ;;  %v231_v15 = vmul.f32 0.03125, %v227_v13  ;;  %v237_v25 = vsub.f32 %v211_v0, %v221_v12 }
 0x182   :  { %v219_v16 = vpop.xlane.xlu0 %218 }
 0x183   :  { %v235_v17 = vsub.f32 %v231_v15, %v233_v14  ;;  %v222_v18 = vmul.f32 0.03125, %v219_v16 }
 0x184   :  { %v230_v19 = vpop.xlane.xlu1 %229 }
 0x185   :  { %v239_v20 = vadd.f32 1e-05, %v235_v17  ;;  %v234_v21 = vmul.f32 %v222_v18, %v222_v18  ;;  %v232_v22 = vmul.f32 0.03125, %v230_v19  ;;  %v238_v29 = vsub.f32 %v212_v1, %v222_v18 }
 0x187   :  { %2132 = vrsqrt.f32 %v239_v20  ;;  %v236_v23 = vsub.f32 %v232_v22, %v234_v21 }
 0x189   :  { %v240_v24 = vadd.f32 1e-05, %v236_v23 }
 0x18b   :  { %2134 = vrsqrt.f32 %v240_v24 }
 0x191   :  { %v2133_v26 = vpop.eup %2132 }
 0x192   :  { %v243_v27 = vmul.f32 %v2133_v26, %v237_v25 }
 0x194   :  { %v252_v32 = vmul.f32 %v1839_v28, %v243_v27 }
 0x195   :  { %v2135_v30 = vpop.eup %2134 }
 0x196   :  { %v244_v31 = vmul.f32 %v2135_v30, %v238_v29  ;;  %v261_v35 = vadd.f32 %v1840_v33, %v252_v32 }
 0x198   :  { %v253_v34 = vmul.f32 %v1839_v28, %v244_v31 }
 0x19a   :  { %v262_v36 = vadd.f32 %v1840_v33, %v253_v34 }
 0x19c   :  { %v263_v37 = vpack.c.bf16 %v262_v36, %v261_v35 }
 0x19e   :  { %1942 = vmatmul.mubr.msk.bf16.vlgmr.msra.gmra.mrb[0].mxu1 %vm213_vm0, %v263_v37 }
 0x19f   :  { %1947 = vmatprep.mubr.msk.bf16.mxu1 %vm2546_vm1, %v2545_v9 }
 0x271   :  { %v317_v38 = vpop.f32.mrb[0].mxu1 }
 0x272   :  { %362 = vrot.lane.b32.xlu1 %v317_v38, %s2547_s12  ;;  %356 = vrot.lane.b32.xlu0 %v317_v38, %s2548_s0  ;;  %v1943_v39 = vpop.f32.mrb[1].mxu1  ;;  %v2833_v42 = vpack.c.bf16 %v317_v38, %v317_v38  ;;  %v324_v43 = vmul.f32 0.35355338, %v317_v38 }
 0x273   :  { %v320_v40 = vpop.f32.mrb[2].mxu1 }
 0x274   :  { %v1944_v41 = vpop.f32.mrb[3].mxu1  ;;  %v2858_v55 = vpack.c.bf16 %v320_v40, %v320_v40  ;;  %v346_v56 = vpack.c.bf16 %v324_v43, %v324_v43  ;;  %v325_v58 = vmul.f32 0.35355338, %v320_v40 }
 0x276   :  { %368 = vrot.lane.b32.xlu1 %v317_v38, %s2549_s23  ;;  %364 = vrot.lane.b32.xlu0 %v320_v40, %s2547_s12  ;;  %v350_v19 = vpack.c.bf16 %v325_v58, %v325_v58 }
 0x27a   :  { %383 = vrot.lane.b32.xlu0 %v2833_v42, %s2550_s26  ;;  %358 = vrot.lane.b32.xlu1 %v320_v40, %s2548_s0 }
 0x27e   :  { %328 = vrot.lane.b32.xlu0 %v324_v43, %s2548_s0  ;;  %370 = vrot.lane.b32.xlu1 %v320_v40, %s2549_s23 }
 0x2e4   :  { %v363_v44 = vpop.permute.xlu1 %362  ;;  %v357_v45 = vpop.permute.xlu0 %356 }
 0x2e5   :  { %v2840_v46 = vpack.c.bf16 %v357_v45, %v357_v45  ;;  %v2844_v49 = vpack.c.bf16 %v363_v44, %v363_v44 }
 0x2e7   :  { %433 = vrot.lane.b32.xlu1 %v2840_v46, %s2550_s26 }
 0x2e8   :  { %v369_v47 = vpop.permute.xlu1 %368  ;;  %v365_v48 = vpop.permute.xlu0 %364 }
 0x2e9   :  { %v2846_v50 = vpack.c.bf16 %v369_v47, %v369_v47  ;;  %v2864_v57 = vpack.c.bf16 %v365_v48, %v365_v48 }
 0x2eb   :  { %531 = vrot.lane.b32.xlu0 %v2846_v50, %s2550_s26  ;;  %482 = vrot.lane.b32.xlu1 %v2844_v49, %s2550_s26 }
 0x2ec   :  { %v384_v51 = vpop.permute.xlu0 %383  ;;  %v359_v53 = vpop.permute.xlu1 %358 }
 0x2ed   :  { %v390_v52 = vsel %vm385_vm2, %v384_v51, 0  ;;  %v2856_v54 = vpack.c.bf16 %v359_v53, %v359_v53 }
 0x2ee   :  { %1946 = vmatpush3.bf16.xpose.msra.mxu1 %v390_v52 }
 0x2ef   :  { %340 = vrot.lane.b32.xlu0 %v324_v43, %s2549_s23  ;;  %334 = vrot.lane.b32.xlu1 %v324_v43, %s2547_s12 }
 0x2f0   :  { %1951 = vmatprep.subr.bf16.mxu1 %v2545_v9  ;;  %v371_v59 = vpop.permute.xlu1 %370  ;;  %v329_v61 = vpop.permute.xlu0 %328 }
 0x2f1   :  { %v2872_v60 = vpack.c.bf16 %v371_v59, %v371_v59  ;;  %v347_v3 = vpack.c.bf16 %v329_v61, %v329_v61 }
 0x2f3   :  { %629 = vrot.lane.b32.xlu0 %v2856_v54, %s2550_s26  ;;  %580 = vrot.lane.b32.xlu1 %v2858_v55, %s2550_s26 }
 0x2f5   :  { %1948 = vmatmul.mubr.msk.bf16.vlgmr.msra.gmra.mrb[4].mxu1 %vm385_vm2, %v346_v56 }
 0x2f6   :  { %1953 = vmatprep.mubr.msk.bf16.mxu1 %vm2546_vm1, %v2545_v9 }
 0x2f7   :  { %678 = vrot.lane.b32.xlu0 %v2864_v57, %s2550_s26  ;;  %330 = vrot.lane.b32.xlu1 %v325_v58, %s2548_s0 }
 0x2fb   :  { %336 = vrot.lane.b32.xlu0 %v325_v58, %s2547_s12  ;;  %727 = vrot.lane.b32.xlu1 %v2872_v60, %s2550_s26 }
 0x2ff   :  { %342 = vrot.lane.b32.xlu1 %v325_v58, %s2549_s23 }
 0x359   :  { %v434_v62 = vpop.permute.xlu1 %433 }
 0x35a   :  { %v439_v63 = vsel %vm385_vm2, %v434_v62, 0 }
 0x35b   :  { %1952 = vmatpush3.bf16.xpose.msra.mxu1 %v439_v63 }
 0x35c   :  { %1957 = vmatprep.subr.bf16.mxu1 %v2545_v9 }
 0x35d   :  { %v532_v0 = vpop.permute.xlu0 %531  ;;  %v483_v1 = vpop.permute.xlu1 %482 }
 0x35e   :  { %v537_v2 = vsel %vm385_vm2, %v532_v0, 0  ;;  %v488_v6 = vsel %vm385_vm2, %v483_v1, 0 }
 0x35f   :  { %1964 = vmatpush3.bf16.xpose.msra.mxu0 %v537_v2 }
 0x360   :  { %1975 = vmatprep.subr.bf16.mxu0 %v2545_v9 }
 0x361   :  { %v341_v4 = vpop.permute.xlu0 %340  ;;  %v335_v5 = vpop.permute.xlu1 %334 }
 0x362   :  { %1954 = vmatmul.mubr.msk.bf16.vlgmr.msra.gmra.mrb[8].mxu1 %vm385_vm2, %v347_v3  ;;  %v349_v7 = vpack.c.bf16 %v341_v4, %v341_v4  ;;  %v348_v12 = vpack.c.bf16 %v335_v5, %v335_v5 }
 0x363   :  { %1958 = vmatpush3.bf16.xpose.msra.mxu1 %v488_v6  ;;  %1959 = vmatprep.mubr.msk.bf16.mxu1 %vm2546_vm1, %v2545_v9 }
 0x364   :  { %1969 = vmatprep.subr.bf16.mxu1 %v2545_v9 }
 0x365   :  { %v630_v8 = vpop.permute.xlu0 %629  ;;  %v581_v10 = vpop.permute.xlu1 %580 }
 0x366   :  { %v635_v11 = vsel %vm385_vm2, %v630_v8, 0  ;;  %1966 = vmatmul.mubr.msk.bf16.vlgmr.msra.gmra.mrb[0].mxu0 %vm385_vm2, %v349_v7  ;;  %v586_v14 = vsel %vm385_vm2, %v581_v10, 0 }
 0x367   :  { %1976 = vmatpush3.bf16.xpose.msra.mxu0 %v635_v11  ;;  %1977 = vmatprep.mubr.msk.bf16.mxu0 %vm2546_vm1, %v2545_v9 }
 0x368   :  { %1987 = vmatprep.subr.bf16.mxu0 %v2545_v9 }
 0x369   :  { %v331_v13 = vpop.permute.xlu1 %330  ;;  %v679_v18 = vpop.permute.xlu0 %678 }
 0x36a   :  { %1960 = vmatmul.mubr.msk.bf16.vlgmr.msra.gmra.mrb[12].mxu1 %vm385_vm2, %v348_v12  ;;  %v351_v15 = vpack.c.bf16 %v331_v13, %v331_v13  ;;  %v684_v21 = vsel %vm385_vm2, %v679_v18, 0  ;;  %v775_v12 = vlaneseq }
 0x36b   :  { %1970 = vmatpush3.bf16.xpose.msra.mxu1 %v586_v14  ;;  %1971 = vmatprep.mubr.msk.bf16.mxu1 %vm2546_vm1, %v2545_v9 }
 0x36c   :  { %1981 = vmatprep.subr.bf16.mxu1 %v2545_v9  ;;  %v2930_v14 = vshrl.u32 %v775_v12, 7 }
 0x36d   :  { %v728_v16 = vpop.permute.xlu1 %727  ;;  %v337_v23 = vpop.permute.xlu0 %336 }
 0x36e   :  { %v733_v17 = vsel %vm385_vm2, %v728_v16, 0  ;;  %1978 = vmatmul.mubr.msk.bf16.vlgmr.msra.gmra.mrb[4].mxu0 %vm385_vm2, %v351_v15  ;;  %v352_v24 = vpack.c.bf16 %v337_v23, %v337_v23  ;;  %v778_v15 = vand.u32 127, %v775_v12  ;;  %v1852_v16 = vld [vmem:[#allocation5] ss:$0 sm:$0xff] }
 0x36f   :  { %1988 = vmatpush3.bf16.xpose.msra.mxu0 %v733_v17  ;;  %1989 = vmatprep.mubr.msk.bf16.mxu0 %vm2546_vm1, %v2545_v9 }
 0x370   :  { %1999 = vmatprep.subr.bf16.mxu0 %v2545_v9  ;;  %vm781_vm3 = vcmp.eq.s32.totalorder %v2930_v14, %v778_v15 }
 0x371   :  { %v343_v20 = vpop.permute.xlu1 %342  ;;  %v796_v17 = vsel %vm781_vm3, 1.0, %v1852_v16 }
 0x372   :  { %1972 = vmatmul.mubr.msk.bf16.vlgmr.msra.gmra.mrb[16].mxu1 %vm385_vm2, %v350_v19  ;;  %v353_v22 = vpack.c.bf16 %v343_v20, %v343_v20 }
 0x373   :  { %1982 = vmatpush3.bf16.xpose.msra.mxu1 %v684_v21  ;;  %1983 = vmatprep.mubr.msk.bf16.mxu1 %vm2546_vm1, %v2545_v9 }
 0x374   :  { %1993 = vmatprep.subr.bf16.mxu1 %v2545_v9 }
 0x376   :  { %1990 = vmatmul.mubr.msk.bf16.vlgmr.msra.gmra.mrb[8].mxu0 %vm385_vm2, %v353_v22 }
 0x377   :  { %2001 = vmatprep.mubr.msk.bf16.mxu0 %vm2546_vm1, %v2545_v9 }
 0x37a   :  { %1984 = vmatmul.mubr.msk.bf16.vlgmr.msra.gmra.mrb[20].mxu1 %vm385_vm2, %v352_v24 }
 0x37b   :  { %1995 = vmatprep.mubr.msk.bf16.mxu1 %vm2546_vm1, %v2545_v9 }
 0x3c8   :  { %v426_v25 = vpop.f32.mrb[4].mxu1 }
 0x3c9   :  { %v1949_v26 = vpop.f32.mrb[5].mxu1  ;;  %v798_v27 = vsel %vm385_vm2, %v426_v25, -inf }
 0x3ca   :  { %799 = vmax.xlane.f32.xlu0 %v798_v27  ;;  %v429_v28 = vpop.f32.mrb[6].mxu1 }
 0x3cb   :  { %v1950_v29 = vpop.f32.mrb[7].mxu1 }
 0x435   :  { %v475_v30 = vpop.f32.mrb[8].mxu1 }
 0x436   :  { %v1955_v31 = vpop.f32.mrb[9].mxu1  ;;  %v801_v32 = vsel %vm385_vm2, %v475_v30, -inf }
 0x437   :  { %802 = vmax.xlane.f32.xlu1 %v801_v32  ;;  %v478_v33 = vpop.f32.mrb[10].mxu1 }
 0x438   :  { %v1956_v34 = vpop.f32.mrb[11].mxu1 }
 0x439   :  { %v573_v35 = vpop.f32.mrb[0].mxu0 }
 0x43a   :  { %v1967_v36 = vpop.f32.mrb[1].mxu0  ;;  %v807_v51 = vsel %vm385_vm2, %v573_v35, -inf }
 0x43b   :  { %v576_v37 = vpop.f32.mrb[2].mxu0 }
 0x43c   :  { %v1968_v38 = vpop.f32.mrb[3].mxu0 }
 0x43d   :  { %v524_v39 = vpop.f32.mrb[12].mxu1 }
 0x43e   :  { %v1961_v40 = vpop.f32.mrb[13].mxu1  ;;  %v804_v41 = vsel %vm385_vm2, %v524_v39, -inf }
 0x43f   :  { %805 = vmax.xlane.f32.xlu0 %v804_v41  ;;  %v527_v43 = vpop.f32.mrb[14].mxu1 }
 0x440   :  { %v1962_v44 = vpop.f32.mrb[15].mxu1 }
 0x441   :  { %v2916_v45 = vpop.f32.mrb[4].mxu0 }
 0x442   :  { %v1979_v47 = vpop.f32.mrb[5].mxu0  ;;  %v813_v48 = vsel %vm385_vm2, %v2916_v45, -inf }
 0x443   :  { %v674_v52 = vpop.f32.mrb[6].mxu0  ;;  %814 = vmax.xlane.f32.xlu1 %v813_v48  ;;  %808 = vmax.xlane.f32.xlu0 %v807_v51 }
 0x444   :  { %v1980_v53 = vpop.f32.mrb[7].mxu0 }
 0x445   :  { %v2921_v56 = vpop.f32.mrb[16].mxu1 }
 0x446   :  { %v1973_v58 = vpop.f32.mrb[17].mxu1  ;;  %v810_v59 = vsel %vm385_vm2, %v2921_v56, -inf }
 0x447   :  { %811 = vmax.xlane.f32.xlu0 %v810_v59  ;;  %v625_v61 = vpop.f32.mrb[18].mxu1 }
 0x448   :  { %v1974_v62 = vpop.f32.mrb[19].mxu1 }
 0x449   :  { %v2925_v63 = vpop.f32.mrb[8].mxu0 }
 0x44a   :  { %v1991_v0 = vpop.f32.mrb[9].mxu0  ;;  %v819_v1 = vsel %vm385_vm2, %v2925_v63, -inf }
 0x44b   :  { %v772_v2 = vpop.f32.mrb[10].mxu0  ;;  %820 = vmax.xlane.f32.xlu1 %v819_v1  ;;  %v1853_v1 = vld [vmem:[#allocation5 + $0x1] ss:$0 sm:$0xff] }
 0x44c   :  { %v1992_v3 = vpop.f32.mrb[11].mxu0  ;;  %v797_v2 = vsel %vm781_vm3, 1.0, %v1853_v1 }
 0x44d   :  { %v720_v4 = vpop.f32.mrb[20].mxu1 }
 0x44e   :  { %v1985_v5 = vpop.f32.mrb[21].mxu1  ;;  %v816_v6 = vsel %vm385_vm2, %v720_v4, -inf }
 0x44f   :  { %817 = vmax.xlane.f32.xlu0 %v816_v6  ;;  %v723_v7 = vpop.f32.mrb[22].mxu1 }
 0x450   :  { %v1986_v8 = vpop.f32.mrb[23].mxu1 }
 0x457   :  { %v800_v10 = vpop.xlane.xlu0 %799 }
 0x458   :  { %v822_v11 = vsub.f32 %v426_v25, %v800_v10 }
 0x45a   :  { %v830_v13 = vmul.f32 1.442695, %v822_v11 }
 0x45c   :  { %2136 = vpow2.f32 %v830_v13 }
 0x466   :  { %v2137_v18 = vpop.eup %2136 }
 0x467   :  { %v846_v19 = vmul.f32 %v2137_v18, %v796_v17 }
 0x469   :  { %v854_v20 = vsel %vm385_vm2, %v846_v19, 0.0  ;;  %v918_v61 = vadd.f32 1.25e-07, %v846_v19 }
 0x46a   :  { %855 = vadd.xlane.f32.xlu0 %v854_v20 }
 0x4c4   :  { %v803_v21 = vpop.xlane.xlu1 %802 }
 0x4c5   :  { %v823_v22 = vsub.f32 %v475_v30, %v803_v21 }
 0x4c7   :  { %v832_v23 = vmul.f32 1.442695, %v823_v22 }
 0x4c9   :  { %2138 = vpow2.f32 %v832_v23 }
 0x4cc   :  { %v806_v24 = vpop.xlane.xlu0 %805 }
 0x4cd   :  { %v824_v25 = vsub.f32 %v524_v39, %v806_v24 }
 0x4cf   :  { %v834_v26 = vmul.f32 1.442695, %v824_v25 }
 0x4d0   :  { %v809_v27 = vpop.xlane.xlu0 %808 }
 0x4d1   :  { %2140 = vpow2.f32 %v834_v26  ;;  %v825_v28 = vsub.f32 %v573_v35, %v809_v27 }
 0x4d3   :  { %v2139_v29 = vpop.eup %2138  ;;  %v836_v31 = vmul.f32 1.442695, %v825_v28 }
 0x4d4   :  { %v2936_v32 = vmul.f32 %v2139_v29, %v796_v17  ;;  %v812_v39 = vpop.xlane.xlu0 %811 }
 0x4d5   :  { %2142 = vpow2.f32 %v836_v31  ;;  %v826_v44 = vsub.f32 %v2921_v56, %v812_v39 }
 0x4d6   :  { %v857_v33 = vsel %vm385_vm2, %v2936_v32, 0.0  ;;  %v919_v23 = vadd.f32 1.25e-07, %v2936_v32 }
 0x4d7   :  { %858 = vadd.xlane.f32.xlu1 %v857_v33  ;;  %v838_v47 = vmul.f32 1.442695, %v826_v44 }
 0x4db   :  { %v2141_v34 = vpop.eup %2140 }
 0x4dc   :  { %v2940_v36 = vmul.f32 %v2141_v34, %v796_v17  ;;  %v818_v40 = vpop.xlane.xlu0 %817 }
 0x4dd   :  { %v828_v48 = vsub.f32 %v720_v4, %v818_v40 }
 0x4de   :  { %v860_v30 = vsel %vm385_vm2, %v2940_v36, 0.0 }
 0x4df   :  { %861 = vadd.xlane.f32.xlu0 %v860_v30  ;;  %v2143_v37 = vpop.eup %2142  ;;  %v842_v51 = vmul.f32 1.442695, %v828_v48 }
 0x4e0   :  { %v2944_v38 = vmul.f32 %v2143_v37, %v796_v17  ;;  %v920_v37 = vadd.f32 1.25e-07, %v2940_v36 }
 0x4e2   :  { %v863_v35 = vsel %vm385_vm2, %v2944_v38, 0.0 }
 0x4e3   :  { %864 = vadd.xlane.f32.xlu1 %v863_v35 }
 0x4f4   :  { %999 = vrot.lane.b32.xlu1 %v2840_v46, %s2532_s28  ;;  %v815_v46 = vpop.xlane.xlu1 %814 }
 0x4f5   :  { %950 = vrot.lane.b32.xlu0 %v2833_v42, %s2532_s28  ;;  %v827_v42 = vsub.f32 %v2916_v45, %v815_v46 }
 0x4f7   :  { %v856_v41 = vpop.xlane.xlu0 %855  ;;  %v840_v62 = vmul.f32 1.442695, %v827_v42 }
 0x4f8   :  { %v878_v43 = vadd.f32 1e-06, %v856_v41  ;;  %1047 = vrot.lane.b32.xlu1 %v2844_v49, %s2532_s28  ;;  %v821_v59 = vpop.xlane.xlu1 %820 }
 0x4f9   :  { %v829_v56 = vsub.f32 %v2925_v63, %v821_v59 }
 0x4fa   :  { %2144 = vrcp.f32 %v878_v43 }
 0x4fb   :  { %2146 = vpow2.f32 %v838_v47  ;;  %v844_v3 = vmul.f32 1.442695, %v829_v56  ;;  %v921_v47 = vadd.f32 1.25e-07, %v2944_v38 }
 0x4fc   :  { %1095 = vrot.lane.b32.xlu1 %v2846_v50, %s2532_s28  ;;  %2148 = vpow2.f32 %v842_v51 }
 0x4fd   :  { %2150 = vpow2.f32 %v840_v62 }
 0x4fe   :  { %2152 = vpow2.f32 %v844_v3 }
 0x504   :  { %v2145_v52 = vpop.eup %2144 }
 0x505   :  { %v894_v53 = vmul.f32 %v2145_v52, %v878_v43  ;;  %v2147_v50 = vpop.eup %2146 }
 0x506   :  { %v2962_v4 = vmul.f32 %v2147_v50, %v797_v2  ;;  %v2149_v45 = vpop.eup %2148 }
 0x507   :  { %v902_v58 = vsub.f32 2.0, %v894_v53  ;;  %v2966_v6 = vmul.f32 %v2149_v45, %v797_v2  ;;  %v2151_v7 = vpop.eup %2150 }
 0x508   :  { %v866_v5 = vsel %vm385_vm2, %v2962_v4, 0.0  ;;  %v2970_v8 = vmul.f32 %v2151_v7, %v797_v2  ;;  %v2153_v10 = vpop.eup %2152  ;;  %v922_v50 = vadd.f32 1.25e-07, %v2962_v4 }
 0x509   :  { %v910_v49 = vmul.f32 %v2145_v52, %v902_v58  ;;  %v872_v63 = vsel %vm385_vm2, %v2966_v6, 0.0  ;;  %v2974_v12 = vmul.f32 %v2153_v10, %v797_v2 }
 0x50a   :  { %v869_v11 = vsel %vm385_vm2, %v2970_v8, 0.0 }
 0x50b   :  { %v926_v0 = vmul.f32 %v918_v61, %v910_v49  ;;  %v875_v13 = vsel %vm385_vm2, %v2974_v12, 0.0 }
 0x50d   :  { %934 = vst.msk [vmem:[#allocation24] sm:$0xff] %vm385_vm2, %v926_v0  ;;  %v942_v22 = vpack.c.bf16 %v926_v0, %v926_v0 }
 0x514   :  { %867 = vadd.xlane.f32.xlu0 %v866_v5 }
 0x518   :  { %873 = vadd.xlane.f32.xlu0 %v872_v63 }
 0x520   :  { %870 = vadd.xlane.f32.xlu1 %v869_v11  ;;  %v924_v11 = vadd.f32 1.25e-07, %v2966_v6 }
 0x524   :  { %876 = vadd.xlane.f32.xlu1 %v875_v13 }
 0x52e   :  { %1143 = vrot.lane.b32.xlu0 %v2858_v55, %s2532_s28 }
 0x532   :  { %1239 = vrot.lane.b32.xlu0 %v2864_v57, %s2532_s28 }
 0x535   :  { %1191 = vrot.lane.b32.xlu1 %v2856_v54, %s2532_s28 }
 0x539   :  { %1287 = vrot.lane.b32.xlu1 %v2872_v60, %s2532_s28  ;;  %s2551_s28 = smov [#allocation24]  }
 0x53a   :  { %s1817_s15 = sshll.u32 %s2551_s28, 4  ;;  %s1818_s15 = int_to_ptr.vmem [resolvable:$true] %s1817_s15 }
 0x53b   :  { %s2464_s16 = scalar_lea.vmem %s1818_s15, 1024  ;;  %p2469_p7 = scmp.lt.s32.totalorder %s1818_s15, %s1818_s15 }
 0x53c   :  { %p2465_p6 = scmp.ne.s32.totalorder %s1818_s15, %s2464_s16  ;;  %p2470_p8 = scmp.lt.s32.totalorder %s2464_s16, %s2464_s16 }
 0x53e   :  { %p2471_p9 = por %p2470_p8, %p2469_p7 }
 0x540   :  { %p2472_p10 = pnand %p2471_p9, %p2465_p6 }
 0x564   :  { %v859_v14 = vpop.xlane.xlu1 %858 }
 0x565   :  { %v879_v15 = vadd.f32 1e-06, %v859_v14 }
 0x567   :  { %2154 = vrcp.f32 %v879_v15 }
 0x56c   :  { %v862_v16 = vpop.xlane.xlu0 %861 }
 0x56d   :  { %v880_v17 = vadd.f32 1e-06, %v862_v16 }
 0x56f   :  { %2156 = vrcp.f32 %v880_v17 }
 0x570   :  { %v951_v18 = vpop.permute.xlu0 %950  ;;  %v865_v20 = vpop.xlane.xlu1 %864 }
 0x571   :  { %v2155_v19 = vpop.eup %2154  ;;  %v957_v55 = vsel %vm955_vm4, %v951_v18, 0  ;;  %v881_v57 = vadd.f32 1e-06, %v865_v20 }
 0x572   :  { %v895_v21 = vmul.f32 %v2155_v19, %v879_v15  ;;  %1994 = vmatpush3.bf16.msra.mxu1 %v957_v55  ;;  %v923_v55 = vadd.f32 1.25e-07, %v2970_v8 }
 0x573   :  { %2005 = vmatprep.subr.bf16.mxu1 %v2545_v9  ;;  %2158 = vrcp.f32 %v881_v57 }
 0x574   :  { %v903_v54 = vsub.f32 2.0, %v895_v21  ;;  %v1000_v60 = vpop.permute.xlu1 %999 }
 0x575   :  { %1996 = vmatmul.mubr.msk.bf16.vlgmr.msra.gmra.mrb[24].mxu1 %vm385_vm2, %v942_v22  ;;  %v1005_v25 = vsel %vm955_vm4, %v1000_v60, 0 }
 0x576   :  { %v911_v24 = vmul.f32 %v2155_v19, %v903_v54  ;;  %2007 = vmatprep.mubr.msk.bf16.mxu1 %vm2546_vm1, %v2545_v9  ;;  %2000 = vmatpush3.bf16.msra.mxu0 %v1005_v25 }
 0x577   :  { %2011 = vmatprep.subr.bf16.mxu0 %v2545_v9 }
 0x578   :  { %v927_v26 = vmul.f32 %v919_v23, %v911_v24  ;;  %v1048_v28 = vpop.permute.xlu1 %1047  ;;  %v925_v23 = vadd.f32 1.25e-07, %v2974_v12  ;;  %v1336_v12 = vld [vmem:[#allocation11] sm:$0xf] }
 0x579   :  { %v2157_v27 = vpop.eup %2156  ;;  %v1053_v33 = vsel %vm955_vm4, %v1048_v28, 0  ;;  %v1391_v28 = vsel %vm955_vm4, %v1336_v12, 0 }
 0x57a   :  { %935 = vst.msk [vmem:[#allocation24 + $0x8] sm:$0xff] %vm385_vm2, %v927_v26  ;;  %v943_v29 = vpack.c.bf16 %v927_v26, %v927_v26  ;;  %v896_v31 = vmul.f32 %v2157_v27, %v880_v17  ;;  %2006 = vmatpush3.bf16.msra.mxu1 %v1053_v33 }
 0x57b   :  { %2017 = vmatprep.subr.bf16.mxu1 %v2545_v9 }
 0x57c   :  { %v904_v32 = vsub.f32 2.0, %v896_v31  ;;  %2002 = vmatmul.mubr.msk.bf16.vlgmr.msra.gmra.mrb[12].mxu0 %vm385_vm2, %v943_v29  ;;  %v1096_v34 = vpop.permute.xlu1 %1095  ;;  %v1339_v29 = vld [vmem:[#allocation11 + $0x4] sm:$0xf] }
 0x57d   :  { %2013 = vmatprep.mubr.msk.bf16.mxu0 %vm2546_vm1, %v2545_v9  ;;  %v2159_v30 = vpop.eup %2158  ;;  %v1101_v39 = vsel %vm955_vm4, %v1096_v34, 0  ;;  %v1344_v31 = vsel %vm955_vm4, %v1339_v29, 0 }
 0x57e   :  { %v912_v35 = vmul.f32 %v2157_v27, %v904_v32  ;;  %v897_v40 = vmul.f32 %v2159_v30, %v881_v57  ;;  %2012 = vmatpush3.bf16.msra.mxu0 %v1101_v39 }
 0x57f   :  { %2023 = vmatprep.subr.bf16.mxu0 %v2545_v9 }
 0x580   :  { %v928_v41 = vmul.f32 %v920_v37, %v912_v35  ;;  %v905_v43 = vsub.f32 2.0, %v897_v40 }
 0x582   :  { %936 = vst.msk [vmem:[#allocation24 + $0x10] sm:$0xff] %vm385_vm2, %v928_v41  ;;  %v944_v44 = vpack.c.bf16 %v928_v41, %v928_v41  ;;  %v913_v48 = vmul.f32 %v2159_v30, %v905_v43 }
 0x584   :  { %2008 = vmatmul.mubr.msk.bf16.vlgmr.msra.gmra.mrb[28].mxu1 %vm385_vm2, %v944_v44  ;;  %v929_v51 = vmul.f32 %v921_v47, %v913_v48 }
 0x585   :  { %2019 = vmatprep.mubr.msk.bf16.mxu1 %vm2546_vm1, %v2545_v9 }
 0x586   :  { %937 = vst.msk [vmem:[#allocation24 + $0x18] sm:$0xff] %vm385_vm2, %v929_v51  ;;  %v945_v36 = vpack.c.bf16 %v929_v51, %v929_v51 }
 0x588   :  { %2014 = vmatmul.mubr.msk.bf16.vlgmr.msra.gmra.mrb[16].mxu0 %vm385_vm2, %v945_v36 }
 0x589   :  { %2025 = vmatprep.mubr.msk.bf16.mxu0 %vm2546_vm1, %v2545_v9 }
 0x5a1   :  { %v868_v52 = vpop.xlane.xlu0 %867 }
 0x5a2   :  { %v882_v46 = vadd.f32 1e-06, %v868_v52 }
 0x5a4   :  { %2160 = vrcp.f32 %v882_v46 }
 0x5a5   :  { %v874_v53 = vpop.xlane.xlu0 %873 }
 0x5a6   :  { %v884_v38 = vadd.f32 1e-06, %v874_v53 }
 0x5a8   :  { %2162 = vrcp.f32 %v884_v38 }
 0x5a9   :  { %v1144_v42 = vpop.permute.xlu0 %1143 }
 0x5aa   :  { %v1149_v58 = vsel %vm955_vm4, %v1144_v42, 0 }
 0x5ab   :  { %2018 = vmatpush3.bf16.msra.mxu1 %v1149_v58 }
 0x5ac   :  { %2029 = vmatprep.subr.bf16.mxu1 %v2545_v9 }
 0x5ad   :  { %v871_v61 = vpop.xlane.xlu1 %870  ;;  %v1240_v7 = vpop.permute.xlu0 %1239 }
 0x5ae   :  { %v2161_v59 = vpop.eup %2160  ;;  %v883_v62 = vadd.f32 1e-06, %v871_v61  ;;  %v1245_v4 = vsel %vm955_vm4, %v1240_v7, 0 }
 0x5af   :  { %v898_v49 = vmul.f32 %v2161_v59, %v882_v46  ;;  %v1488_v46 = vld [vmem:[#allocation11 + $0xc] sm:$0xf] }
 0x5b0   :  { %2164 = vrcp.f32 %v883_v62  ;;  %v1493_v58 = vsel %vm955_vm4, %v1488_v46, 0 }
 0x5b1   :  { %v906_v56 = vsub.f32 2.0, %v898_v49  ;;  %v877_v1 = vpop.xlane.xlu1 %876 }
 0x5b2   :  { %v2163_v0 = vpop.eup %2162  ;;  %v885_v45 = vadd.f32 1e-06, %v877_v1 }
 0x5b3   :  { %v914_v2 = vmul.f32 %v2161_v59, %v906_v56  ;;  %v900_v3 = vmul.f32 %v2163_v0, %v884_v38 }
 0x5b4   :  { %2166 = vrcp.f32 %v885_v45 }
 0x5b5   :  { %v930_v5 = vmul.f32 %v922_v50, %v914_v2  ;;  %v908_v63 = vsub.f32 2.0, %v900_v3  ;;  %v1192_v10 = vpop.permute.xlu1 %1191  ;;  %v1436_v50 = vld [vmem:[#allocation11 + $0x8] sm:$0xf] }
 0x5b6   :  { %v1197_v15 = vsel %vm955_vm4, %v1192_v10, 0 }
 0x5b7   :  { %938 = vst.msk [vmem:[#allocation24 + $0x20] sm:$0xff] %vm385_vm2, %v930_v5  ;;  %v946_v13 = vpack.c.bf16 %v930_v5, %v930_v5  ;;  %v916_v14 = vmul.f32 %v2163_v0, %v908_v63  ;;  %2024 = vmatpush3.bf16.msra.mxu0 %v1197_v15  ;;  %v1441_v5 = vsel %vm955_vm4, %v1436_v50, 0 }
 0x5b8   :  { %2035 = vmatprep.subr.bf16.mxu0 %v2545_v9 }
 0x5b9   :  { %v932_v16 = vmul.f32 %v924_v11, %v916_v14  ;;  %2020 = vmatmul.mubr.msk.bf16.vlgmr.msra.gmra.mrb[32].mxu1 %vm385_vm2, %v946_v13  ;;  %v1288_v60 = vpop.permute.xlu1 %1287 }
 0x5ba   :  { %2030 = vmatpush3.bf16.msra.mxu1 %v1245_v4  ;;  %2031 = vmatprep.mubr.msk.bf16.mxu1 %vm2546_vm1, %v2545_v9  ;;  %v2165_v17 = vpop.eup %2164  ;;  %v1293_v27 = vsel %vm955_vm4, %v1288_v60, 0 }
 0x5bb   :  { %940 = vst.msk [vmem:[#allocation24 + $0x30] sm:$0xff] %vm385_vm2, %v932_v16  ;;  %2041 = vmatprep.subr.bf16.mxu1 %v2545_v9  ;;  %v899_v6 = vmul.f32 %v2165_v17, %v883_v62  ;;  %v948_v20 = vpack.c.bf16 %v932_v16, %v932_v16 }
 0x5bd   :  { %v907_v18 = vsub.f32 2.0, %v899_v6 }
 0x5be   :  { %v2167_v19 = vpop.eup %2166 }
 0x5bf   :  { %v915_v21 = vmul.f32 %v2165_v17, %v907_v18  ;;  %v901_v57 = vmul.f32 %v2167_v19, %v885_v45 }
 0x5c1   :  { %2032 = vmatmul.mubr.msk.bf16.vlgmr.msra.gmra.mrb[36].mxu1 %vm385_vm2, %v948_v20  ;;  %v931_v22 = vmul.f32 %v923_v55, %v915_v21  ;;  %v909_v54 = vsub.f32 2.0, %v901_v57 }
 0x5c2   :  { %2043 = vmatprep.mubr.msk.bf16.mxu1 %vm2546_vm1, %v2545_v9  ;;  %2042 = vmatpush3.bf16.msra.mxu1 %v1344_v31 }
 0x5c3   :  { %939 = vst.msk [vmem:[#allocation24 + $0x28] sm:$0xff] %vm385_vm2, %v931_v22  ;;  %v947_v24 = vpack.c.bf16 %v931_v22, %v931_v22  ;;  %v917_v25 = vmul.f32 %v2167_v19, %v909_v54  ;;  %2053 = vmatprep.subr.bf16.mxu1 %v2545_v9 }
 0x5c5   :  { %v933_v26 = vmul.f32 %v925_v23, %v917_v25  ;;  %2026 = vmatmul.mubr.msk.bf16.vlgmr.msra.gmra.mrb[20].mxu0 %vm385_vm2, %v947_v24  ;;  %v1866_v25 = vld [vmem:[#allocation13] ss:$0 sm:$0xff] }
 0x5c6   :  { %2036 = vmatpush3.bf16.msra.mxu0 %v1293_v27  ;;  %2037 = vmatprep.mubr.msk.bf16.mxu0 %vm2546_vm1, %v2545_v9 }
 0x5c7   :  { %941 = vst.msk [vmem:[#allocation24 + $0x38] sm:$0xff] %vm385_vm2, %v933_v26  ;;  %2047 = vmatprep.subr.bf16.mxu0 %v2545_v9  ;;  %v949_v8 = vpack.c.bf16 %v933_v26, %v933_v26 }
 0x5cd   :  { %2038 = vmatmul.mubr.msk.bf16.vlgmr.msra.gmra.mrb[24].mxu0 %vm385_vm2, %v949_v8 }
 0x5ce   :  { %2049 = vmatprep.mubr.msk.bf16.mxu0 %vm2546_vm1, %v2545_v9  ;;  %2048 = vmatpush3.bf16.msra.mxu0 %v1391_v28 }
 0x5cf   :  { %2059 = vmatprep.subr.bf16.mxu0 %v2545_v9 }
 0x648   :  { %v993_v33 = vpop.f32.mrb[24].mxu1 }
 0x649   :  { %v1997_v32 = vpop.f32.mrb[25].mxu1 }
 0x64a   :  { %v996_v34 = vpop.f32.mrb[26].mxu1  ;;  %v2176_v32 = vld [vmem:[#allocation2] sm:$0xff] }
 0x64b   :  { %v1998_v30 = vpop.f32.mrb[27].mxu1 }
 0x64f   :  { %v1041_v37 = vpop.f32.mrb[12].mxu0 }
 0x650   :  { %v2003_v35 = vpop.f32.mrb[13].mxu0 }
 0x651   :  { %v1044_v39 = vpop.f32.mrb[14].mxu0 }
 0x652   :  { %v2004_v40 = vpop.f32.mrb[15].mxu0 }
 0x657   :  { %v1089_v41 = vpop.f32.mrb[28].mxu1 }
 0x658   :  { %v2009_v43 = vpop.f32.mrb[29].mxu1 }
 0x659   :  { %v1092_v44 = vpop.f32.mrb[30].mxu1 }
 0x65a   :  { %v2010_v47 = vpop.f32.mrb[31].mxu1 }
 0x65b   :  { %v1137_v48 = vpop.f32.mrb[16].mxu0 }
 0x65c   :  { %v2015_v51 = vpop.f32.mrb[17].mxu0 }
 0x65d   :  { %v1140_v36 = vpop.f32.mrb[18].mxu0  ;;  %v2123_v51 = vld [vmem:[#allocation17 + $0x8] sm:$0xff]  }
 0x65e   :  { %v2016_v52 = vpop.f32.mrb[19].mxu0 }
 0x68c   :  { %v1185_v53 = vpop.f32.mrb[32].mxu1 }
 0x68d   :  { %v1335_v38 = vpack.c.bf16 %v1185_v53, %v993_v33  ;;  %v2021_v42 = vpop.f32.mrb[33].mxu1 }
 0x68e   :  { %v1188_v59 = vpop.f32.mrb[34].mxu1 }
 0x68f   :  { %v2022_v61 = vpop.f32.mrb[35].mxu1  ;;  %2050 = vmatmul.mubr.msk.bf16.vlgmr.msra.gmra.mrb[28].mxu0 %vm385_vm2, %v1335_v38 }
 0x690   :  { %2060 = vmatpush3.bf16.msra.mxu0 %v1493_v58  ;;  %2061 = vmatprep.mubr.msk.bf16.mxu0 %vm2546_vm1, %v2545_v9 }
 0x691   :  { %2073 = vmatprep.subr.bf16.mxu0 %v2545_v9 }
 0x694   :  { %v1281_v49 = vpop.f32.mrb[36].mxu1 }
 0x695   :  { %v1434_v62 = vpack.c.bf16 %v1281_v49, %v1089_v41  ;;  %v2033_v56 = vpop.f32.mrb[37].mxu1 }
 0x696   :  { %v1284_v0 = vpop.f32.mrb[38].mxu1 }
 0x697   :  { %v2034_v1 = vpop.f32.mrb[39].mxu1 }
 0x698   :  { %v1233_v2 = vpop.f32.mrb[20].mxu0 }
 0x699   :  { %v1337_v3 = vpack.c.bf16 %v1233_v2, %v1041_v37  ;;  %v2027_v45 = vpop.f32.mrb[21].mxu0  ;;  %v2177_v37 = vld [vmem:[#allocation2 + $0x8] sm:$0xff] }
 0x69a   :  { %v1236_v63 = vpop.f32.mrb[22].mxu0  ;;  %v1867_v45 = vld [vmem:[#allocation14] ss:$0 sm:$0xff] }
 0x69b   :  { %v2028_v7 = vpop.f32.mrb[23].mxu0  ;;  %2044 = vmatmul.mubr.msk.bf16.vlgmr.msra.gmra.mrb[40].mxu1 %vm385_vm2, %v1337_v3 }
 0x69c   :  { %2054 = vmatpush3.bf16.msra.mxu1 %v1441_v5  ;;  %2055 = vmatprep.mubr.msk.bf16.mxu1 %vm2546_vm1, %v2545_v9 }
 0x69d   :  { %2065 = vmatprep.subr.bf16.mxu1 %v2545_v9 }
 0x6a0   :  { %v1329_v10 = vpop.f32.mrb[24].mxu0 }
 0x6a1   :  { %v1486_v11 = vpack.c.bf16 %v1329_v10, %v1137_v48  ;;  %v2039_v13 = vpop.f32.mrb[25].mxu0  ;;  %v2122_v48 = vld [vmem:[#allocation17] sm:$0xff]  }
 0x6a2   :  { %v1332_v14 = vpop.f32.mrb[26].mxu0 }
 0x6a3   :  { %v2040_v15 = vpop.f32.mrb[27].mxu0  ;;  %2056 = vmatmul.mubr.msk.bf16.vlgmr.msra.gmra.mrb[44].mxu1 %vm385_vm2, %v1434_v62  ;;  %2062 = vmatmul.mubr.msk.bf16.vlgmr.msra.gmra.mrb[32].mxu0 %vm385_vm2, %v1486_v11  ;;  %v1868_v11 = vld [vmem:[#allocation16] ss:$0 sm:$0xff] }
 0x6a4   :  { %2069 = vmatprep.mubr.msk.bf16.mxu1 %vm2546_vm1, %v2545_v9  ;;  %2089 = vmatprep.mubr.msk.bf16.mxu0 %vm2546_vm1, %v2545_v9 }
 0x6a5   :  { %2066 = vmatpush3.bf16.msra.mxu1 %v2122_v48 }
 0x6a6   :  { %2067 = vmatprep.subr.bf16.mxu1 %v2545_v9 }
 0x6a9   :  { %2068 = vmatpush3.bf16.msra.mxu1 %v2123_v51 }
 0x762   :  { %v1427_v16 = vpop.f32.mrb[28].mxu0 }
 0x763   :  { %v2051_v4 = vpop.f32.mrb[29].mxu0 }
 0x764   :  { %v1430_v17 = vpop.f32.mrb[30].mxu0  ;;  %v2124_v4 = vld [vmem:[#allocation20] sm:$0xff]  }
 0x765   :  { %v2052_v6 = vpop.f32.mrb[31].mxu0  ;;  %2074 = vmatpush3.bf16.msra.mxu0 %v2124_v4 }
 0x766   :  { %2075 = vmatprep.subr.bf16.mxu0 %v2545_v9  ;;  %v2126_v6 = vld [vmem:[#allocation20 + $0x10] sm:$0xff]  }
 0x76e   :  { %v1380_v18 = vpop.f32.mrb[40].mxu1 }
 0x76f   :  { %v1428_v19 = vadd.f32 %v1427_v16, %v1380_v18  ;;  %v2045_v20 = vpop.f32.mrb[41].mxu1  ;;  %v2127_v18 = vld [vmem:[#allocation20 + $0x18] sm:$0xff]  }
 0x770   :  { %v1383_v55 = vpop.f32.mrb[42].mxu1  ;;  %v2129_v20 = vld [vmem:[#allocation20 + $0x28] sm:$0xff]  }
 0x771   :  { %v1431_v21 = vadd.f32 %v1430_v17, %v1383_v55  ;;  %v2046_v57 = vpop.f32.mrb[43].mxu1  ;;  %v2125_v17 = vld [vmem:[#allocation20 + $0x8] sm:$0xff]   ;;  %v2130_v55 = vld [vmem:[#allocation20 + $0x30] sm:$0xff]  }
 0x772   :  { %2076 = vmatpush3.bf16.msra.mxu0 %v2125_v17  ;;  %v1869_v57 = vld [vmem:[#allocation19] ss:$0 sm:$0xff] }
 0x773   :  { %2077 = vmatprep.subr.bf16.mxu0 %v2545_v9 }
 0x776   :  { %v1477_v22 = vpop.f32.mrb[44].mxu1  ;;  %v1529_v54 = vpop.f32.mrb[32].mxu0  ;;  %2078 = vmatpush3.bf16.msra.mxu0 %v2126_v6 }
 0x777   :  { %v1484_v60 = vadd.f32 %v1477_v22, %v1428_v19  ;;  %v2057_v23 = vpop.f32.mrb[45].mxu1  ;;  %v2063_v24 = vpop.f32.mrb[33].mxu0  ;;  %2079 = vmatprep.subr.bf16.mxu0 %v2545_v9  ;;  %v2128_v19 = vld [vmem:[#allocation20 + $0x20] sm:$0xff]  }
 0x778   :  { %v1480_v26 = vpop.f32.mrb[46].mxu1  ;;  %v1532_v27 = vpop.f32.mrb[34].mxu0 }
 0x779   :  { %v1536_v8 = vadd.f32 %v1529_v54, %v1484_v60  ;;  %v1485_v12 = vadd.f32 %v1480_v26, %v1431_v21  ;;  %v2058_v28 = vpop.f32.mrb[47].mxu1  ;;  %v2064_v29 = vpop.f32.mrb[35].mxu0  ;;  %v2131_v21 = vld [vmem:[#allocation20 + $0x38] sm:$0xff]  }
 0x77a   :  { %2080 = vmatpush3.bf16.msra.mxu0 %v2127_v18 }
 0x77b   :  { %v1545_v31 = vadd.f32 %v1866_v25, %v1536_v8  ;;  %v1537_v33 = vadd.f32 %v1532_v27, %v1485_v12  ;;  %2081 = vmatprep.subr.bf16.mxu0 %v2545_v9 }
 0x77d   :  { %v3060_v34 = vadd.f32 %v2176_v32, %v1545_v31  ;;  %v1546_v30 = vadd.f32 %v1866_v25, %v1537_v33 }
 0x77e   :  { %2082 = vmatpush3.bf16.msra.mxu0 %v2128_v19 }
 0x77f   :  { %v3062_v35 = vadd.f32 %v2177_v37, %v1546_v30  ;;  %v1549_v39 = vsel %vm213_vm0, %v3060_v34, 0.0  ;;  %v1557_v40 = vmul.f32 %v3060_v34, %v3060_v34  ;;  %2083 = vmatprep.subr.bf16.mxu0 %v2545_v9 }
 0x780   :  { %1550 = vadd.xlane.f32.xlu0 %v1549_v39 }
 0x781   :  { %v1552_v41 = vsel %vm213_vm0, %v3062_v35, 0.0  ;;  %v1559_v43 = vsel %vm213_vm0, %v1557_v40, 0.0  ;;  %v1558_v44 = vmul.f32 %v3062_v35, %v3062_v35 }
 0x782   :  { %1553 = vadd.xlane.f32.xlu1 %v1552_v41  ;;  %2084 = vmatpush3.bf16.msra.mxu0 %v2129_v20 }
 0x783   :  { %v1562_v47 = vsel %vm213_vm0, %v1558_v44, 0.0  ;;  %2085 = vmatprep.subr.bf16.mxu0 %v2545_v9 }
 0x784   :  { %1560 = vadd.xlane.f32.xlu0 %v1559_v43 }
 0x786   :  { %2086 = vmatpush3.bf16.msra.mxu0 %v2130_v55 }
 0x787   :  { %2087 = vmatprep.subr.bf16.mxu0 %v2545_v9 }
 0x788   :  { %1563 = vadd.xlane.f32.xlu0 %v1562_v47 }
 0x78a   :  { %2088 = vmatpush3.bf16.msra.mxu0 %v2131_v21 }
 0x80d   :  { %v1551_v36 = vpop.xlane.xlu0 %1550 }
 0x80e   :  { %v1555_v52 = vmul.f32 0.03125, %v1551_v36 }
 0x80f   :  { %v1554_v46 = vpop.xlane.xlu1 %1553 }
 0x810   :  { %v1567_v38 = vmul.f32 %v1555_v52, %v1555_v52  ;;  %v1556_v42 = vmul.f32 0.03125, %v1554_v46  ;;  %v1571_v50 = vsub.f32 %v3060_v34, %v1555_v52 }
 0x811   :  { %v1561_v53 = vpop.xlane.xlu0 %1560 }
 0x812   :  { %v1565_v58 = vmul.f32 0.03125, %v1561_v53  ;;  %v1568_v49 = vmul.f32 %v1556_v42, %v1556_v42  ;;  %v1572_v5 = vsub.f32 %v3062_v35, %v1556_v42 }
 0x814   :  { %v1569_v59 = vsub.f32 %v1565_v58, %v1567_v38 }
 0x815   :  { %v1564_v61 = vpop.xlane.xlu0 %1563 }
 0x816   :  { %v1573_v62 = vadd.f32 1e-05, %v1569_v59  ;;  %v1566_v56 = vmul.f32 0.03125, %v1564_v61 }
 0x818   :  { %2168 = vrsqrt.f32 %v1573_v62  ;;  %v1570_v0 = vsub.f32 %v1566_v56, %v1568_v49 }
 0x81a   :  { %v1574_v1 = vadd.f32 1e-05, %v1570_v0 }
 0x81c   :  { %2170 = vrsqrt.f32 %v1574_v1 }
 0x822   :  { %v2169_v2 = vpop.eup %2168 }
 0x823   :  { %v1577_v3 = vmul.f32 %v2169_v2, %v1571_v50 }
 0x825   :  { %v1586_v10 = vmul.f32 %v1867_v45, %v1577_v3 }
 0x826   :  { %v2171_v63 = vpop.eup %2170 }
 0x827   :  { %v1578_v7 = vmul.f32 %v2171_v63, %v1572_v5  ;;  %v1595_v14 = vadd.f32 %v1868_v11, %v1586_v10 }
 0x829   :  { %v1587_v13 = vmul.f32 %v1867_v45, %v1578_v7 }
 0x82b   :  { %v1596_v15 = vadd.f32 %v1868_v11, %v1587_v13 }
 0x82d   :  { %v1597_v16 = vpack.c.bf16 %v1596_v15, %v1595_v14 }
 0x82f   :  { %2070 = vmatmul.mubr.msk.bf16.vlgmr.msra.gmra.mrb[48].mxu1 %vm213_vm0, %v1597_v16 }
 0x902   :  { %v1658_v22 = vpop.f32.mrb[48].mxu1 }
 0x903   :  { %v1659_v54 = vadd.f32 %v1869_v57, %v1658_v22  ;;  %v2071_v60 = vpop.f32.mrb[49].mxu1 }
 0x904   :  { %v1661_v23 = vpop.f32.mrb[50].mxu1 }
 0x905   :  { %v1665_v24 = vmul.f32 %v1659_v54, %v1659_v54  ;;  %v1662_v25 = vadd.f32 %v1869_v57, %v1661_v23  ;;  %v2072_v26 = vpop.f32.mrb[51].mxu1 }
 0x907   :  { %v1667_v27 = vmul.f32 %v1665_v24, %v1659_v54  ;;  %v1666_v8 = vmul.f32 %v1662_v25, %v1662_v25 }
 0x909   :  { %v1669_v12 = vmul.f32 0.044715, %v1667_v27  ;;  %v1668_v28 = vmul.f32 %v1666_v8, %v1662_v25 }
 0x90b   :  { %v1671_v29 = vadd.f32 %v1669_v12, %v1659_v54  ;;  %v1670_v31 = vmul.f32 0.044715, %v1668_v28 }
 0x90d   :  { %v1673_v33 = vmul.f32 0.7978846, %v1671_v29  ;;  %v1672_v32 = vadd.f32 %v1670_v31, %v1662_v25 }
 0x90f   :  { %2172 = vtanh.f32 %v1673_v33  ;;  %v1674_v9 = vmul.f32 0.7978846, %v1672_v32 }
 0x911   :  { %2174 = vtanh.f32 %v1674_v9 }
 0x919   :  { %v2173_v30 = vpop.eup %2172 }
 0x91a   :  { %v1677_v37 = vadd.f32 1.0, %v2173_v30 }
 0x91b   :  { %v2175_v39 = vpop.eup %2174 }
 0x91c   :  { %v1679_v40 = vmul.f32 0.5, %v1677_v37  ;;  %v1678_v41 = vadd.f32 1.0, %v2175_v39 }
 0x91e   :  { %v1680_v43 = vmul.f32 0.5, %v1678_v41  ;;  %v1681_v44 = vmul.f32 %v1679_v40, %v1659_v54 }
 0x920   :  { %v1682_v47 = vmul.f32 %v1680_v43, %v1662_v25 }
 0x922   :  { %v1683_v48 = vpack.c.bf16 %v1682_v47, %v1681_v44 }
 0x924   :  { %2090 = vmatmul.mubr.bf16.vlgmr.msra.gmra.mrb[36].mxu0 %v1683_v48 }
 0x925   :  { %2475 = shalt.err (!%p2472_p10)
}
 0x926   :  { %s2476_s20 = scalar_lea.hbm %s3133_s14, 1024 }
 0x927   :  { %p2477_p11 = scmp.ne.s32.totalorder %s3133_s14, %s2476_s20  ;;  %p2480_p12 = scmp.lt.u32.totalorder %s2476_s20, %s3133_s14 }
 0x929   :  { %p2482_p13 = pnand %p2480_p12, %p2477_p11 }
 0x92b   :  { %2485 = shalt.err (!%p2482_p13)
}
 0x92c   :  { %1823 = dma.vmem_to_hbm [thread:$0]  %s1818_s15, 1024, %s3133_s14, [#allocation25], %s2537_s11, %s2537_s11, %s2538_s21   ;;  %v1873_v51 = vld [vmem:[#allocation22] ss:$0 sm:$0xff] }
 0x92d   :  { %s2552_s1 = smov [#allocation23]  }
 0x92e   :  { %s1805_s9 = sshll.u32 %s2552_s1, 4  ;;  %s1806_s9 = int_to_ptr.vmem [resolvable:$true] %s1805_s9 }
 0x92f   :  { %s2486_s19 = scalar_lea.vmem %s1806_s9, 256  ;;  %p2491_p1 = scmp.lt.s32.totalorder %s1806_s9, %s1806_s9 }
 0x930   :  { %p2487_p0 = scmp.ne.s32.totalorder %s1806_s9, %s2486_s19  ;;  %p2492_p2 = scmp.lt.s32.totalorder %s2486_s19, %s2486_s19 }
 0x932   :  { %p2493_p3 = por %p2492_p2, %p2491_p1 }
 0x934   :  { %p2494_p4 = pnand %p2493_p3, %p2487_p0 }
 0x9f7   :  { %v1789_v36 = vpop.f32.mrb[36].mxu0 }
 0x9f8   :  { %v1790_v52 = vadd.f32 %v1873_v51, %v1789_v36  ;;  %v2091_v46 = vpop.f32.mrb[37].mxu0 }
 0x9f9   :  { %v1792_v53 = vpop.f32.mrb[38].mxu0 }
 0x9fa   :  { %v1796_v38 = vadd.f32 %v1790_v52, %v3060_v34  ;;  %v1793_v42 = vadd.f32 %v1873_v51, %v1792_v53  ;;  %v2092_v58 = vpop.f32.mrb[39].mxu0 }
 0x9fc   :  { %1798 = vst.msk [vmem:[#allocation23] sm:$0xff] %vm213_vm0, %v1796_v38  ;;  %v1797_v59 = vadd.f32 %v1793_v42, %v3062_v35 }
 0x9fe   :  { %1799 = vst.msk [vmem:[#allocation23 + $0x8] sm:$0xff] %vm213_vm0, %v1797_v59 }
 0x9ff   :  { %2497 = shalt.err (!%p2494_p4)
}
 0xa00   :  { %s2498_s3 = scalar_lea.hbm %s3132_s13, 256 }
 0xa01   :  { %p2499_p5 = scmp.ne.s32.totalorder %s3132_s13, %s2498_s3  ;;  %p2502_p6 = scmp.lt.u32.totalorder %s2498_s3, %s3132_s13 }
 0xa03   :  { %p2504_p7 = pnand %p2502_p6, %p2499_p5 }
 0xa05   :  { %2507 = shalt.err (!%p2504_p7)
}
 0xa06   :  { %1811 = dma.vmem_to_hbm [thread:$0]  %s1806_s9, 256, %s3132_s13, [#allocation4], %s2537_s11, %s2537_s11, %s2538_s21  }
 0xa07   :  { %2522 = dma.done.wait [#allocation4], 256  }
 0xa08   :  { %2523 = vsyncadd [#allocation4], 4294967040 }
 0xa09   :  { %2524 = dma.done.wait [#allocation25], 1024  }
 0xa0a   :  { %2525 = vsyncadd [#allocation25], 4294966272 }
 0xa0b   :  { %1830 = vsyncpa [#allocation3], 1 }
 0xa0c   :  { %1831 = vsyncpa [#allocation6], 1 }
 0xa0d   :  { %1832 = vsyncpa [#allocation9], 1 }
 0xa0e   :  { %1833 = vsyncpa [#allocation12], 1 }
 0xa0f   :  { %1834 = vsyncpa [#allocation15], 1 }
 0xa10   :  { %1835 = vsyncpa [#allocation18], 1 }
 0xa11   :  { %1836 = vsyncpa [#allocation21], 1 }
 0xa12   :  { %1837 = vsyncpa [#allocation4], 1 }
 0xa13   :  { %1838 = vsyncpa [#allocation25], 1 }

</bundles_post_ra>
